<compile_context>
chip_gen: v7x
topology: tpu7x:2x2x1
jax: 0.10.0
libtpu: 0.0.40
codegen_flags: <defaults>
</compile_context>

<pallas_src>
import functools
import inspect

import jax
import jax.numpy as jnp
from jax.experimental import pallas as pl
from jax.experimental.pallas import tpu as pltpu


def _round_up(x, m):
    return (x + m - 1) // m * m


try:
    _HAS_BUFFERED = (hasattr(pl, "Buffered")
                     and "pipeline_mode" in inspect.signature(pl.BlockSpec).parameters)
except Exception:  # pragma: no cover - defensive
    _HAS_BUFFERED = False


def _lstm_tagger_kernel(seq_len, apply_t_mask,
                        emb_ref,      # (Tc, Bb, E)     bf16
                        w_ih_ref,     # (E, 4H)         bf16
                        w_hh_ref,     # (H, 4H)         bf16
                        b_ref,        # (1, 4H)         f32  (b_ih + b_hh)
                        w_tmpl_ref,   # (H, nTmpl)      bf16
                        b_tmpl_ref,   # (1, nTmpl)      f32
                        w_tag_ref,    # (H, nTag)       bf16
                        b_tag_ref,    # (1, nTag)       f32
                        tmpl_out_ref, # (Bb, nTmpl)     f32
                        tag_out_ref,  # (Tc, Bb, nTag)  f32
                        h_ref,        # (Bb, H)  f32 VMEM scratch, persists across grid
                        c_ref,        # (Bb, H)  f32 VMEM scratch
                        gates_ref,    # (Tc, Bb, 4H) bf16 VMEM scratch (hoisted input proj)
                        hist_ref):    # (Tc, Bb, H)  bf16 VMEM scratch (h history)
    t_chunk = pl.program_id(1)
    T_c, B, E = emb_ref.shape
    H = w_hh_ref.shape[0]
    n_tag = w_tag_ref.shape[1]

    # Reset the recurrent state at the start of each batch shard's time sweep.
    @pl.when(t_chunk == 0)
    def _():
        h_ref[...] = jnp.zeros_like(h_ref)
        c_ref[...] = jnp.zeros_like(c_ref)

    # (1) Input projection hoisted out of the recurrence: one big MXU matmul
    #     (bf16 operands, f32 accumulate) for all timesteps of this chunk.
    emb_flat = emb_ref[...].reshape(T_c * B, E)
    gates_in = (jnp.dot(emb_flat, w_ih_ref[...],
                        preferred_element_type=jnp.float32) + b_ref[...])
    gates_ref[...] = gates_in.reshape(T_c, B, 4 * H).astype(gates_ref.dtype)

    def _sigmoid(x):  # 1 EUP op instead of exp + divide
        return 0.5 * jnp.tanh(0.5 * x) + 0.5

    # Small manual unroll (capped at 4 per review) so the scheduler can overlap
    # EUP/VPU gate math of step t with the recurrent MXU matmul of step t+1
    # without blowing the 64-vreg file.
    unroll = 4 if T_c % 4 == 0 else (2 if T_c % 2 == 0 else 1)

    def outer(i, carry):
        h, c = carry
        for u in range(unroll):
            t = i * unroll + u
            # w_hh_ref[...] referenced inside the dot (not hoisted) so Mosaic
            # streams it from VMEM into the MXU with no register cost.
            gates = gates_ref[t].astype(jnp.float32) + jnp.dot(
                h.astype(jnp.bfloat16), w_hh_ref[...],
                preferred_element_type=jnp.float32)
            # PyTorch gate order: i, f, g, o (H multiple of 128 -> clean slices)
            i_g = _sigmoid(gates[:, 0 * H:1 * H])
            f_g = _sigmoid(gates[:, 1 * H:2 * H])
            g_g = jnp.tanh(gates[:, 2 * H:3 * H])
            o_g = _sigmoid(gates[:, 3 * H:4 * H])
            c_new = f_g * c + i_g * g_g
            h_new = o_g * jnp.tanh(c_new)
            if apply_t_mask:
                # Freeze the state on padded timesteps so h_n stays correct.
                valid = (t_chunk * T_c + t) < seq_len
                c_new = jnp.where(valid, c_new, c)
                h_new = jnp.where(valid, h_new, h)
            hist_ref[t] = h_new.astype(hist_ref.dtype)
            h, c = h_new, c_new
        return (h, c)

    if apply_t_mask:
        # Skip fully-padded steps: only run ceil(valid/unroll) groups; the
        # per-step freeze mask above handles the partial last group.  Tag rows
        # for unwritten (padded) steps are stale but sliced away in the wrapper.
        valid_steps = jnp.clip(seq_len - t_chunk * T_c, 0, T_c)
        n_groups = (valid_steps + unroll - 1) // unroll
    else:
        n_groups = T_c // unroll

    h_fin, c_fin = jax.lax.fori_loop(0, n_groups, outer,
                                     (h_ref[...], c_ref[...]))
    h_ref[...] = h_fin
    c_ref[...] = c_fin

    # (2) Token-tagger head batched over the whole chunk: one big bf16 MXU
    #     matmul, one lane-dense f32 store.
    hist_flat = hist_ref[...].reshape(T_c * B, H)
    tag = (jnp.dot(hist_flat, w_tag_ref[...],
                   preferred_element_type=jnp.float32) + b_tag_ref[...])
    tag_out_ref[...] = tag.reshape(T_c, B, n_tag)

    # (3) Template classifier head on the final hidden state, at the last chunk.
    @pl.when(t_chunk == pl.num_programs(1) - 1)
    def _():
        tmpl_out_ref[...] = (jnp.dot(h_ref[...].astype(jnp.bfloat16),
                                     w_tmpl_ref[...],
                                     preferred_element_type=jnp.float32)
                             + b_tmpl_ref[...])


def _pick_tiling(B, T, E, H_pad, n_tmpl_pad, n_tag_pad, vmem_budget):
    """Derive (block_b, chunk_t) from a VMEM budget; feed 2 cores when possible."""
    B_pad8 = _round_up(B, 8)
    if B_pad8 >= 32:
        # >=2 batch shards so v7x's two TensorCores both get work; cap at 128
        # (fills v5e MXU rows; good default for v6e/v7x too).
        block_b = min(128, _round_up(-(-B_pad8 // 2), 8))
    else:
        block_b = B_pad8
    chunk_t = min(64, _round_up(T, 8))

    def est(bb, tc):
        bb8 = _round_up(bb, 8)
        lane_e = _round_up(E, 128)
        v = 0
        v += 2 * tc * bb8 * lane_e * 2           # emb blocks (bf16, double-buffered)
        v += 2 * tc * bb8 * n_tag_pad * 4        # tag out blocks (f32, double-buffered)
        v += 2 * bb8 * n_tmpl_pad * 4            # tmpl out blocks
        v += (_round_up(E, 16) * 4 * H_pad + H_pad * 4 * H_pad
              + H_pad * (n_tmpl_pad + n_tag_pad)) * 2   # weights (bf16, single buf)
        v += (4 * H_pad + n_tmpl_pad + n_tag_pad) * 4 * 8  # biases (sublane padded)
        v += 2 * bb8 * H_pad * 4                 # h, c carries (f32)
        v += tc * bb8 * 4 * H_pad * 2            # gates scratch (bf16)
        v += tc * bb8 * H_pad * 2                # hist scratch (bf16)
        return v

    while est(block_b, chunk_t) > vmem_budget and chunk_t > 8:
        chunk_t //= 2
    while est(block_b, chunk_t) > vmem_budget and block_b > 8:
        block_b = _round_up(block_b // 2, 8)
    return block_b, chunk_t


@jax.jit
def lstm_classifier_tagger(input_ids, params):
    """input_ids: (B, T) int32. Returns (template_logits (B,nTmpl), tag_logits (B,T,nTag))."""
    emb_table = params["embedding"]          # (V, E)  f32
    w_ih_T = params["w_ih_T"]                # (E, 4H) f32
    w_hh_T = params["w_hh_T"]                # (H, 4H) f32
    b_lstm = params["b_lstm"]                # (1, 4H) f32
    w_tmpl_T = params["w_tmpl_T"]            # (H, nTmpl) f32
    b_tmpl = params["b_tmpl"]                # (1, nTmpl) f32
    w_tag_T = params["w_tag_T"]              # (H, nTag) f32
    b_tag = params["b_tag"]                  # (1, nTag) f32

    B, T = input_ids.shape
    V, E = emb_table.shape
    H = w_hh_T.shape[0]
    n_tmpl = w_tmpl_T.shape[1]
    n_tag = w_tag_T.shape[1]

    # ---- (8,128)-aligned padding of the lane dims ---------------------------
    H_pad = _round_up(H, 128)
    n_tmpl_pad = _round_up(n_tmpl, 128)
    n_tag_pad = _round_up(n_tag, 128)

    # ---- generation-aware VMEM budget / tiling ------------------------------
    try:
        vmem_cap = int(pltpu.get_tpu_info().vmem_capacity_bytes)
    except Exception:
        vmem_cap = 64 * 1024 * 1024          # v7x-safe fallback (64 MiB / TC)
    vmem_limit = max(32 * 1024 * 1024,
                     min(vmem_cap * 3 // 4, 100 * 1024 * 1024))

    block_b, chunk_t = _pick_tiling(B, T, E, H_pad, n_tmpl_pad, n_tag_pad,
                                    int(vmem_limit * 0.9))
    B_pad = _round_up(B, block_b)
    T_pad = _round_up(T, chunk_t)
    apply_t_mask = (T_pad != T)

    # Pad LSTM weights *per gate* so each gate slice lands on an H_pad-lane
    # boundary; zero padding keeps padded h/c lanes exactly zero.
    def pad_gate_cols(w, rows, rows_pad):
        w = w.reshape(rows, 4, H)
        w = jnp.pad(w, ((0, rows_pad - rows), (0, 0), (0, H_pad - H)))
        return w.reshape(rows_pad, 4 * H_pad)

    w_ih_p = pad_gate_cols(w_ih_T, E, E).astype(jnp.bfloat16)       # E unpadded
    w_hh_p = pad_gate_cols(w_hh_T, H, H_pad).astype(jnp.bfloat16)
    b_p = jnp.pad(b_lstm.reshape(4, H),
                  ((0, 0), (0, H_pad - H))).reshape(1, 4 * H_pad)   # f32

    w_tmpl_p = jnp.pad(w_tmpl_T, ((0, H_pad - H), (0, n_tmpl_pad - n_tmpl))
                       ).astype(jnp.bfloat16)
    b_tmpl_p = jnp.pad(b_tmpl, ((0, 0), (0, n_tmpl_pad - n_tmpl)))
    w_tag_p = jnp.pad(w_tag_T, ((0, H_pad - H), (0, n_tag_pad - n_tag))
                      ).astype(jnp.bfloat16)
    b_tag_p = jnp.pad(b_tag, ((0, 0), (0, n_tag_pad - n_tag)))

    # Embedding gather fused with the time-major transpose; staged in bf16 with
    # UNPADDED E to minimize the extra HBM pass.
    emb_tbf = jnp.take(emb_table.astype(jnp.bfloat16), input_ids.T, axis=0)  # (T,B,E)
    emb_tbf = jnp.pad(emb_tbf, ((0, T_pad - T), (0, B_pad - B), (0, 0)))
    # TODO(synk): move the embedding gather in-kernel via PrefetchScalarGridSpec
    # (scalar-prefetched ids + DMA from the HBM table) to avoid staging (T,B,E).

    grid = (B_pad // block_b, T_pad // chunk_t)
    kernel = functools.partial(_lstm_tagger_kernel, T, apply_t_mask)

    def _const_spec(shape):
        # Weights/biases never change block index -> single-buffer them when
        # the running JAX supports pipeline_mode (saves a full weight copy of VMEM).
        idx = lambda b, c: (0, 0)
        if _HAS_BUFFERED:
            return pl.BlockSpec(shape, idx, pipeline_mode=pl.Buffered(1))
        return pl.BlockSpec(shape, idx)

    tmpl_p, tag_p = pl.pallas_call(
        kernel,
        out_shape=(
            jax.ShapeDtypeStruct((B_pad, n_tmpl_pad), jnp.float32),
            jax.ShapeDtypeStruct((T_pad, B_pad, n_tag_pad), jnp.float32),
        ),
        grid=grid,
        in_specs=[
            pl.BlockSpec((chunk_t, block_b, E), lambda b, c: (c, b, 0)),
            _const_spec((E, 4 * H_pad)),
            _const_spec((H_pad, 4 * H_pad)),
            _const_spec((1, 4 * H_pad)),
            _const_spec((H_pad, n_tmpl_pad)),
            _const_spec((1, n_tmpl_pad)),
            _const_spec((H_pad, n_tag_pad)),
            _const_spec((1, n_tag_pad)),
        ],
        out_specs=(
            pl.BlockSpec((block_b, n_tmpl_pad), lambda b, c: (b, 0)),
            pl.BlockSpec((chunk_t, block_b, n_tag_pad), lambda b, c: (c, b, 0)),
        ),
        scratch_shapes=[
            pltpu.VMEM((block_b, H_pad), jnp.float32),                 # h carry
            pltpu.VMEM((block_b, H_pad), jnp.float32),                 # c carry
            pltpu.VMEM((chunk_t, block_b, 4 * H_pad), jnp.bfloat16),   # hoisted gates
            pltpu.VMEM((chunk_t, block_b, H_pad), jnp.bfloat16),       # h history
        ],
        compiler_params=pltpu.CompilerParams(
            dimension_semantics=("parallel", "arbitrary"),
            vmem_limit_bytes=int(vmem_limit),
        ),
    )(emb_tbf, w_ih_p, w_hh_p, b_p, w_tmpl_p, b_tmpl_p, w_tag_p, b_tag_p)

    tmpl_logits = tmpl_p[:B, :n_tmpl]
    # TODO(synk): emit (B, T, nTag) directly from the kernel (in-VMEM sublane
    # transpose of each chunk's tag block) to drop this XLA transpose pass.
    tag_logits = jnp.transpose(tag_p[:T, :B, :n_tag], (1, 0, 2))   # (B, T, nTag)
    return tmpl_logits, tag_logits


def init_params(key, vocab_size, embedding_dim, hidden_dim, num_templates, num_tags,
                pad_idx=0):
    """Deterministic init mirroring the PyTorch module's parameter shapes."""
    ks = jax.random.split(key, 10)
    H = hidden_dim
    k_lstm = 1.0 / jnp.sqrt(H)

    emb = jax.random.normal(ks[0], (vocab_size, embedding_dim), jnp.float32)
    emb = emb.at[pad_idx].set(0.0)  # nn.Embedding zeroes the padding_idx row

    def u(k, shape, scale):
        return jax.random.uniform(k, shape, jnp.float32, -scale, scale)

    w_ih = u(ks[1], (4 * H, embedding_dim), k_lstm)   # PyTorch weight_ih_l0
    w_hh = u(ks[2], (4 * H, H), k_lstm)               # PyTorch weight_hh_l0
    b_ih = u(ks[3], (4 * H,), k_lstm)
    b_hh = u(ks[4], (4 * H,), k_lstm)

    k_head = 1.0 / jnp.sqrt(H)
    w_tmpl = u(ks[5], (num_templates, H), k_head)
    b_tmpl = u(ks[6], (num_templates,), k_head)
    w_tag = u(ks[7], (num_tags, H), k_head)
    b_tag = u(ks[8], (num_tags,), k_head)

    return {
        "embedding": emb,
        "w_ih_T": w_ih.T,                              # (E, 4H)
        "w_hh_T": w_hh.T,                              # (H, 4H)
        "b_lstm": (b_ih + b_hh)[None, :],              # (1, 4H)
        "w_tmpl_T": w_tmpl.T,                          # (H, nTmpl)
        "b_tmpl": b_tmpl[None, :],                     # (1, nTmpl)
        "w_tag_T": w_tag.T,                            # (H, nTag)
        "b_tag": b_tag[None, :],                       # (1, nTag)
    }


def _reference_forward(input_ids, params):
    """Pure-JAX f32 reference of the PyTorch forward, for verification."""
    emb = jnp.take(params["embedding"], input_ids, axis=0)   # (B, T, E)
    B, T, _ = emb.shape
    H = params["w_hh_T"].shape[0]

    def step(carry, x_t):
        h, c = carry
        gates = x_t @ params["w_ih_T"] + h @ params["w_hh_T"] + params["b_lstm"]
        i_g = jax.nn.sigmoid(gates[:, 0 * H:1 * H])
        f_g = jax.nn.sigmoid(gates[:, 1 * H:2 * H])
        g_g = jnp.tanh(gates[:, 2 * H:3 * H])
        o_g = jax.nn.sigmoid(gates[:, 3 * H:4 * H])
        c_new = f_g * c + i_g * g_g
        h_new = o_g * jnp.tanh(c_new)
        return (h_new, c_new), h_new

    init = (jnp.zeros((B, H), jnp.float32), jnp.zeros((B, H), jnp.float32))
    (h_fin, _), outs_tbf = jax.lax.scan(step, init, jnp.transpose(emb, (1, 0, 2)))
    outputs = jnp.transpose(outs_tbf, (1, 0, 2))              # (B, T, H)
    tmpl_logits = h_fin @ params["w_tmpl_T"] + params["b_tmpl"]
    tag_logits = outputs @ params["w_tag_T"] + params["b_tag"]
    return tmpl_logits, tag_logits


if __name__ == "__main__":
    # Small shapes consistent with the module's forward.
    VOCAB = 64
    EMB_DIM = 16
    HIDDEN = 32
    N_TEMPLATES = 8
    N_TAGS = 8
    BATCH = 2
    SEQ = 8

    key = jax.random.PRNGKey(0)
    k_params, k_ids = jax.random.split(key)

    params = init_params(k_params, VOCAB, EMB_DIM, HIDDEN, N_TEMPLATES, N_TAGS)
    input_ids = jax.random.randint(k_ids, (BATCH, SEQ), 0, VOCAB, dtype=jnp.int32)

    tmpl_logits, tag_logits = lstm_classifier_tagger(input_ids, params)
    jax.block_until_ready((tmpl_logits, tag_logits))

    # Sanity: shapes and numerics vs. pure-f32 JAX reference.  The kernel uses
    # bf16 MXU operands + bf16 gate/hist scratch, so compare at bf16 tolerance.
    assert tmpl_logits.shape == (BATCH, N_TEMPLATES)
    assert tag_logits.shape == (BATCH, SEQ, N_TAGS)
    ref_tmpl, ref_tag = _reference_forward(input_ids, params)
    assert jnp.allclose(tmpl_logits, ref_tmpl, atol=1e-1, rtol=1e-1), \
        float(jnp.max(jnp.abs(tmpl_logits - ref_tmpl)))
    assert jnp.allclose(tag_logits, ref_tag, atol=1e-1, rtol=1e-1), \
        float(jnp.max(jnp.abs(tag_logits - ref_tag)))

    print("KERNEL_OK")
</pallas_src>

<mosaic_0001>
module attributes {stable_mosaic.version = 11 : i64} {
  func.func @_lstm_tagger_kernel(%arg0: i32, %arg1: i32, %arg2: memref<8x8x16xbf16, #tpu.memory_space<vmem>>, %arg3: memref<16x512xbf16, #tpu.memory_space<vmem>>, %arg4: memref<128x512xbf16, #tpu.memory_space<vmem>>, %arg5: memref<1x512xf32, #tpu.memory_space<vmem>>, %arg6: memref<128x128xbf16, #tpu.memory_space<vmem>>, %arg7: memref<1x128xf32, #tpu.memory_space<vmem>>, %arg8: memref<128x128xbf16, #tpu.memory_space<vmem>>, %arg9: memref<1x128xf32, #tpu.memory_space<vmem>>, %arg10: memref<8x128xf32, #tpu.memory_space<vmem>>, %arg11: memref<8x8x128xf32, #tpu.memory_space<vmem>>, %arg12: memref<8x128xf32, #tpu.memory_space<vmem>>, %arg13: memref<8x128xf32, #tpu.memory_space<vmem>>, %arg14: memref<8x8x512xbf16, #tpu.memory_space<vmem>>, %arg15: memref<8x8x128xbf16, #tpu.memory_space<vmem>>) attributes {dimension_semantics = [#tpu.dimension_semantics<parallel>, #tpu.dimension_semantics<arbitrary>], iteration_bounds = array<i64: 1, 1>, scalar_prefetch = 0 : i64, scratch_operands = 4 : i64, tpu.core_type = #tpu.core_type<tc>, window_params = [{transform_indices = @transform_0, window_bounds = array<i64: 8, 8, 16>}, {pipeline_mode = #tpu.pipeline_mode<synchronous>, transform_indices = @transform_1, window_bounds = array<i64: 16, 512>}, {pipeline_mode = #tpu.pipeline_mode<synchronous>, transform_indices = @transform_2, window_bounds = array<i64: 128, 512>}, {pipeline_mode = #tpu.pipeline_mode<synchronous>, transform_indices = @transform_3, window_bounds = array<i64: 1, 512>}, {pipeline_mode = #tpu.pipeline_mode<synchronous>, transform_indices = @transform_4, window_bounds = array<i64: 128, 128>}, {pipeline_mode = #tpu.pipeline_mode<synchronous>, transform_indices = @transform_5, window_bounds = array<i64: 1, 128>}, {pipeline_mode = #tpu.pipeline_mode<synchronous>, transform_indices = @transform_6, window_bounds = array<i64: 128, 128>}, {pipeline_mode = #tpu.pipeline_mode<synchronous>, transform_indices = @transform_7, window_bounds = array<i64: 1, 128>}, {transform_indices = @transform_8, window_bounds = array<i64: 8, 128>}, {transform_indices = @transform_9, window_bounds = array<i64: 8, 8, 128>}]} {
    %c0_i32 = arith.constant 0 : i32
    %0 = arith.cmpi eq, %arg1, %c0_i32 : i32
    %1 = arith.extui %0 : i1 to i32
    %c0_i32_0 = arith.constant 0 : i32
    %2 = arith.cmpi ne, %1, %c0_i32_0 : i32
    scf.if %2 {
      %cst_33 = arith.constant 0.000000e+00 : f32
      %31 = vector.broadcast %cst_33 : f32 to vector<8x128xf32>
      %c0_34 = arith.constant 0 : index
      %c0_35 = arith.constant 0 : index
      %32 = vector.load %arg12[%c0_34, %c0_35] : memref<8x128xf32, #tpu.memory_space<vmem>>, vector<8x128xf32>
      tpu.vector_store %arg12[%c0_34, %c0_35], %31 {strides = array<i32>} : memref<8x128xf32, #tpu.memory_space<vmem>>, vector<8x128xf32>,
      %cst_36 = arith.constant 0.000000e+00 : f32
      %33 = vector.broadcast %cst_36 : f32 to vector<8x128xf32>
      %c0_37 = arith.constant 0 : index
      %c0_38 = arith.constant 0 : index
      %34 = vector.load %arg13[%c0_37, %c0_38] : memref<8x128xf32, #tpu.memory_space<vmem>>, vector<8x128xf32>
      tpu.vector_store %arg13[%c0_37, %c0_38], %33 {strides = array<i32>} : memref<8x128xf32, #tpu.memory_space<vmem>>, vector<8x128xf32>,
    } else {
    }
    %c0 = arith.constant 0 : index
    %c0_1 = arith.constant 0 : index
    %c0_2 = arith.constant 0 : index
    %3 = vector.load %arg2[%c0, %c0_1, %c0_2] : memref<8x8x16xbf16, #tpu.memory_space<vmem>>, vector<8x8x16xbf16>
    %4 = vector.shape_cast %3 : vector<8x8x16xbf16> to vector<64x16xbf16>
    %c0_3 = arith.constant 0 : index
    %c0_4 = arith.constant 0 : index
    %5 = vector.load %arg3[%c0_3, %c0_4] : memref<16x512xbf16, #tpu.memory_space<vmem>>, vector<16x512xbf16>
    %cst = arith.constant dense<0.000000e+00> : vector<64x512xf32>
    %6 = tpu.matmul %4, %5, %cst {dimension_numbers = #tpu.dot_dimension_numbers<[1], [0], [0], [1], [0, 0, 1, 1], [], []>} : vector<64x16xbf16>, vector<16x512xbf16>, vector<64x512xf32> -> vector<64x512xf32>
    %c0_5 = arith.constant 0 : index
    %c0_6 = arith.constant 0 : index
    %7 = vector.load %arg5[%c0_5, %c0_6] : memref<1x512xf32, #tpu.memory_space<vmem>>, vector<1x512xf32>
    %8 = vector.broadcast %7 : vector<1x512xf32> to vector<64x512xf32>
    %9 = arith.addf %6, %8 : vector<64x512xf32>
    %10 = vector.shape_cast %9 : vector<64x512xf32> to vector<8x8x512xf32>
    %11 = arith.truncf %10 : vector<8x8x512xf32> to vector<8x8x512xbf16>
    %c0_7 = arith.constant 0 : index
    %c0_8 = arith.constant 0 : index
    %c0_9 = arith.constant 0 : index
    %12 = vector.load %arg14[%c0_7, %c0_8, %c0_9] : memref<8x8x512xbf16, #tpu.memory_space<vmem>>, vector<8x8x512xbf16>
    tpu.vector_store %arg14[%c0_7, %c0_8, %c0_9], %11 {strides = array<i32>} : memref<8x8x512xbf16, #tpu.memory_space<vmem>>, vector<8x8x512xbf16>,
    %c0_10 = arith.constant 0 : index
    %c0_11 = arith.constant 0 : index
    %13 = vector.load %arg12[%c0_10, %c0_11] : memref<8x128xf32, #tpu.memory_space<vmem>>, vector<8x128xf32>
    %c0_12 = arith.constant 0 : index
    %c0_13 = arith.constant 0 : index
    %14 = vector.load %arg13[%c0_12, %c0_13] : memref<8x128xf32, #tpu.memory_space<vmem>>, vector<8x128xf32>
    %c0_i32_14 = arith.constant 0 : i32
    %c2_i32 = arith.constant 2 : i32
    %15 = arith.addi %c0_i32_14, %c2_i32 : i32
    %c1_i32 = arith.constant 1 : i32
    %16:2 = scf.for %arg16 = %c0_i32_14 to %15 step %c1_i32 iter_args(%arg17 = %13, %arg18 = %14) -> (vector<8x128xf32>, vector<8x128xf32>)  : i32 {
      %c4_i32 = arith.constant 4 : i32
      %31 = arith.muli %arg16, %c4_i32 : i32
      %c0_i32_33 = arith.constant 0 : i32
      %32 = arith.addi %31, %c0_i32_33 : i32
      %33 = arith.index_cast %32 : i32 to index
      %c0_34 = arith.constant 0 : index
      %c0_35 = arith.constant 0 : index
      %34 = vector.load %arg14[%33, %c0_34, %c0_35] : memref<8x8x512xbf16, #tpu.memory_space<vmem>>, vector<1x8x512xbf16>
      %35 = vector.shape_cast %34 : vector<1x8x512xbf16> to vector<8x512xbf16>
      %36 = arith.extf %35 : vector<8x512xbf16> to vector<8x512xf32>
      %37 = arith.truncf %arg17 : vector<8x128xf32> to vector<8x128xbf16>
      %c0_36 = arith.constant 0 : index
      %c0_37 = arith.constant 0 : index
      %38 = vector.load %arg4[%c0_36, %c0_37] : memref<128x512xbf16, #tpu.memory_space<vmem>>, vector<128x512xbf16>
      %cst_38 = arith.constant dense<0.000000e+00> : vector<8x512xf32>
      %39 = tpu.matmul %37, %38, %cst_38 {dimension_numbers = #tpu.dot_dimension_numbers<[1], [0], [0], [1], [0, 0, 1, 1], [], []>} : vector<8x128xbf16>, vector<128x512xbf16>, vector<8x512xf32> -> vector<8x512xf32>
      %40 = arith.addf %36, %39 : vector<8x512xf32>
      %41 = vector.extract_strided_slice %40 {offsets = [0, 0], sizes = [8, 128], strides = [1, 1]} : vector<8x512xf32> to vector<8x128xf32>
      %cst_39 = arith.constant 5.000000e-01 : f32
      %42 = vector.broadcast %cst_39 : f32 to vector<8x128xf32>
      %43 = arith.mulf %42, %41 : vector<8x128xf32>
      %44 = math.tanh %43 : vector<8x128xf32>
      %cst_40 = arith.constant 5.000000e-01 : f32
      %45 = vector.broadcast %cst_40 : f32 to vector<8x128xf32>
      %46 = arith.mulf %45, %44 : vector<8x128xf32>
      %cst_41 = arith.constant 5.000000e-01 : f32
      %47 = vector.broadcast %cst_41 : f32 to vector<8x128xf32>
      %48 = arith.addf %46, %47 : vector<8x128xf32>
      %49 = vector.extract_strided_slice %40 {offsets = [0, 128], sizes = [8, 128], strides = [1, 1]} : vector<8x512xf32> to vector<8x128xf32>
      %cst_42 = arith.constant 5.000000e-01 : f32
      %50 = vector.broadcast %cst_42 : f32 to vector<8x128xf32>
      %51 = arith.mulf %50, %49 : vector<8x128xf32>
      %52 = math.tanh %51 : vector<8x128xf32>
      %cst_43 = arith.constant 5.000000e-01 : f32
      %53 = vector.broadcast %cst_43 : f32 to vector<8x128xf32>
      %54 = arith.mulf %53, %52 : vector<8x128xf32>
      %cst_44 = arith.constant 5.000000e-01 : f32
      %55 = vector.broadcast %cst_44 : f32 to vector<8x128xf32>
      %56 = arith.addf %54, %55 : vector<8x128xf32>
      %57 = vector.extract_strided_slice %40 {offsets = [0, 256], sizes = [8, 128], strides = [1, 1]} : vector<8x512xf32> to vector<8x128xf32>
      %58 = math.tanh %57 : vector<8x128xf32>
      %59 = vector.extract_strided_slice %40 {offsets = [0, 384], sizes = [8, 128], strides = [1, 1]} : vector<8x512xf32> to vector<8x128xf32>
      %cst_45 = arith.constant 5.000000e-01 : f32
      %60 = vector.broadcast %cst_45 : f32 to vector<8x128xf32>
      %61 = arith.mulf %60, %59 : vector<8x128xf32>
      %62 = math.tanh %61 : vector<8x128xf32>
      %cst_46 = arith.constant 5.000000e-01 : f32
      %63 = vector.broadcast %cst_46 : f32 to vector<8x128xf32>
      %64 = arith.mulf %63, %62 : vector<8x128xf32>
      %cst_47 = arith.constant 5.000000e-01 : f32
      %65 = vector.broadcast %cst_47 : f32 to vector<8x128xf32>
      %66 = arith.addf %64, %65 : vector<8x128xf32>
      %67 = arith.mulf %56, %arg18 : vector<8x128xf32>
      %68 = arith.mulf %48, %58 : vector<8x128xf32>
      %69 = arith.addf %67, %68 : vector<8x128xf32>
      %70 = math.tanh %69 : vector<8x128xf32>
      %71 = arith.mulf %66, %70 : vector<8x128xf32>
      %72 = arith.truncf %71 : vector<8x128xf32> to vector<8x128xbf16>
      %73 = arith.index_cast %32 : i32 to index
      %c0_48 = arith.constant 0 : index
      %c0_49 = arith.constant 0 : index
      %74 = vector.load %arg15[%73, %c0_48, %c0_49] : memref<8x8x128xbf16, #tpu.memory_space<vmem>>, vector<1x8x128xbf16>
      %75 = vector.shape_cast %74 : vector<1x8x128xbf16> to vector<8x128xbf16>
      %76 = vector.shape_cast %72 : vector<8x128xbf16> to vector<1x8x128xbf16>
      tpu.vector_store %arg15[%73, %c0_48, %c0_49], %76 {strides = array<i32>} : memref<8x8x128xbf16, #tpu.memory_space<vmem>>, vector<1x8x128xbf16>,
      %c4_i32_50 = arith.constant 4 : i32
      %77 = arith.muli %arg16, %c4_i32_50 : i32
      %c1_i32_51 = arith.constant 1 : i32
      %78 = arith.addi %77, %c1_i32_51 : i32
      %79 = arith.index_cast %78 : i32 to index
      %c0_52 = arith.constant 0 : index
      %c0_53 = arith.constant 0 : index
      %80 = vector.load %arg14[%79, %c0_52, %c0_53] : memref<8x8x512xbf16, #tpu.memory_space<vmem>>, vector<1x8x512xbf16>
      %81 = vector.shape_cast %80 : vector<1x8x512xbf16> to vector<8x512xbf16>
      %82 = arith.extf %81 : vector<8x512xbf16> to vector<8x512xf32>
      %83 = arith.truncf %71 : vector<8x128xf32> to vector<8x128xbf16>
      %c0_54 = arith.constant 0 : index
      %c0_55 = arith.constant 0 : index
      %84 = vector.load %arg4[%c0_54, %c0_55] : memref<128x512xbf16, #tpu.memory_space<vmem>>, vector<128x512xbf16>
      %cst_56 = arith.constant dense<0.000000e+00> : vector<8x512xf32>
      %85 = tpu.matmul %83, %84, %cst_56 {dimension_numbers = #tpu.dot_dimension_numbers<[1], [0], [0], [1], [0, 0, 1, 1], [], []>} : vector<8x128xbf16>, vector<128x512xbf16>, vector<8x512xf32> -> vector<8x512xf32>
      %86 = arith.addf %82, %85 : vector<8x512xf32>
      %87 = vector.extract_strided_slice %86 {offsets = [0, 0], sizes = [8, 128], strides = [1, 1]} : vector<8x512xf32> to vector<8x128xf32>
      %cst_57 = arith.constant 5.000000e-01 : f32
      %88 = vector.broadcast %cst_57 : f32 to vector<8x128xf32>
      %89 = arith.mulf %88, %87 : vector<8x128xf32>
      %90 = math.tanh %89 : vector<8x128xf32>
      %cst_58 = arith.constant 5.000000e-01 : f32
      %91 = vector.broadcast %cst_58 : f32 to vector<8x128xf32>
      %92 = arith.mulf %91, %90 : vector<8x128xf32>
      %cst_59 = arith.constant 5.000000e-01 : f32
      %93 = vector.broadcast %cst_59 : f32 to vector<8x128xf32>
      %94 = arith.addf %92, %93 : vector<8x128xf32>
      %95 = vector.extract_strided_slice %86 {offsets = [0, 128], sizes = [8, 128], strides = [1, 1]} : vector<8x512xf32> to vector<8x128xf32>
      %cst_60 = arith.constant 5.000000e-01 : f32
      %96 = vector.broadcast %cst_60 : f32 to vector<8x128xf32>
      %97 = arith.mulf %96, %95 : vector<8x128xf32>
      %98 = math.tanh %97 : vector<8x128xf32>
      %cst_61 = arith.constant 5.000000e-01 : f32
      %99 = vector.broadcast %cst_61 : f32 to vector<8x128xf32>
      %100 = arith.mulf %99, %98 : vector<8x128xf32>
      %cst_62 = arith.constant 5.000000e-01 : f32
      %101 = vector.broadcast %cst_62 : f32 to vector<8x128xf32>
      %102 = arith.addf %100, %101 : vector<8x128xf32>
      %103 = vector.extract_strided_slice %86 {offsets = [0, 256], sizes = [8, 128], strides = [1, 1]} : vector<8x512xf32> to vector<8x128xf32>
      %104 = math.tanh %103 : vector<8x128xf32>
      %105 = vector.extract_strided_slice %86 {offsets = [0, 384], sizes = [8, 128], strides = [1, 1]} : vector<8x512xf32> to vector<8x128xf32>
      %cst_63 = arith.constant 5.000000e-01 : f32
      %106 = vector.broadcast %cst_63 : f32 to vector<8x128xf32>
      %107 = arith.mulf %106, %105 : vector<8x128xf32>
      %108 = math.tanh %107 : vector<8x128xf32>
      %cst_64 = arith.constant 5.000000e-01 : f32
      %109 = vector.broadcast %cst_64 : f32 to vector<8x128xf32>
      %110 = arith.mulf %109, %108 : vector<8x128xf32>
      %cst_65 = arith.constant 5.000000e-01 : f32
      %111 = vector.broadcast %cst_65 : f32 to vector<8x128xf32>
      %112 = arith.addf %110, %111 : vector<8x128xf32>
      %113 = arith.mulf %102, %69 : vector<8x128xf32>
      %114 = arith.mulf %94, %104 : vector<8x128xf32>
      %115 = arith.addf %113, %114 : vector<8x128xf32>
      %116 = math.tanh %115 : vector<8x128xf32>
      %117 = arith.mulf %112, %116 : vector<8x128xf32>
      %118 = arith.truncf %117 : vector<8x128xf32> to vector<8x128xbf16>
      %119 = arith.index_cast %78 : i32 to index
      %c0_66 = arith.constant 0 : index
      %c0_67 = arith.constant 0 : index
      %120 = vector.load %arg15[%119, %c0_66, %c0_67] : memref<8x8x128xbf16, #tpu.memory_space<vmem>>, vector<1x8x128xbf16>
      %121 = vector.shape_cast %120 : vector<1x8x128xbf16> to vector<8x128xbf16>
      %122 = vector.shape_cast %118 : vector<8x128xbf16> to vector<1x8x128xbf16>
      tpu.vector_store %arg15[%119, %c0_66, %c0_67], %122 {strides = array<i32>} : memref<8x8x128xbf16, #tpu.memory_space<vmem>>, vector<1x8x128xbf16>,
      %c4_i32_68 = arith.constant 4 : i32
      %123 = arith.muli %arg16, %c4_i32_68 : i32
      %c2_i32_69 = arith.constant 2 : i32
      %124 = arith.addi %123, %c2_i32_69 : i32
      %125 = arith.index_cast %124 : i32 to index
      %c0_70 = arith.constant 0 : index
      %c0_71 = arith.constant 0 : index
      %126 = vector.load %arg14[%125, %c0_70, %c0_71] : memref<8x8x512xbf16, #tpu.memory_space<vmem>>, vector<1x8x512xbf16>
      %127 = vector.shape_cast %126 : vector<1x8x512xbf16> to vector<8x512xbf16>
      %128 = arith.extf %127 : vector<8x512xbf16> to vector<8x512xf32>
      %129 = arith.truncf %117 : vector<8x128xf32> to vector<8x128xbf16>
      %c0_72 = arith.constant 0 : index
      %c0_73 = arith.constant 0 : index
      %130 = vector.load %arg4[%c0_72, %c0_73] : memref<128x512xbf16, #tpu.memory_space<vmem>>, vector<128x512xbf16>
      %cst_74 = arith.constant dense<0.000000e+00> : vector<8x512xf32>
      %131 = tpu.matmul %129, %130, %cst_74 {dimension_numbers = #tpu.dot_dimension_numbers<[1], [0], [0], [1], [0, 0, 1, 1], [], []>} : vector<8x128xbf16>, vector<128x512xbf16>, vector<8x512xf32> -> vector<8x512xf32>
      %132 = arith.addf %128, %131 : vector<8x512xf32>
      %133 = vector.extract_strided_slice %132 {offsets = [0, 0], sizes = [8, 128], strides = [1, 1]} : vector<8x512xf32> to vector<8x128xf32>
      %cst_75 = arith.constant 5.000000e-01 : f32
      %134 = vector.broadcast %cst_75 : f32 to vector<8x128xf32>
      %135 = arith.mulf %134, %133 : vector<8x128xf32>
      %136 = math.tanh %135 : vector<8x128xf32>
      %cst_76 = arith.constant 5.000000e-01 : f32
      %137 = vector.broadcast %cst_76 : f32 to vector<8x128xf32>
      %138 = arith.mulf %137, %136 : vector<8x128xf32>
      %cst_77 = arith.constant 5.000000e-01 : f32
      %139 = vector.broadcast %cst_77 : f32 to vector<8x128xf32>
      %140 = arith.addf %138, %139 : vector<8x128xf32>
      %141 = vector.extract_strided_slice %132 {offsets = [0, 128], sizes = [8, 128], strides = [1, 1]} : vector<8x512xf32> to vector<8x128xf32>
      %cst_78 = arith.constant 5.000000e-01 : f32
      %142 = vector.broadcast %cst_78 : f32 to vector<8x128xf32>
      %143 = arith.mulf %142, %141 : vector<8x128xf32>
      %144 = math.tanh %143 : vector<8x128xf32>
      %cst_79 = arith.constant 5.000000e-01 : f32
      %145 = vector.broadcast %cst_79 : f32 to vector<8x128xf32>
      %146 = arith.mulf %145, %144 : vector<8x128xf32>
      %cst_80 = arith.constant 5.000000e-01 : f32
      %147 = vector.broadcast %cst_80 : f32 to vector<8x128xf32>
      %148 = arith.addf %146, %147 : vector<8x128xf32>
      %149 = vector.extract_strided_slice %132 {offsets = [0, 256], sizes = [8, 128], strides = [1, 1]} : vector<8x512xf32> to vector<8x128xf32>
      %150 = math.tanh %149 : vector<8x128xf32>
      %151 = vector.extract_strided_slice %132 {offsets = [0, 384], sizes = [8, 128], strides = [1, 1]} : vector<8x512xf32> to vector<8x128xf32>
      %cst_81 = arith.constant 5.000000e-01 : f32
      %152 = vector.broadcast %cst_81 : f32 to vector<8x128xf32>
      %153 = arith.mulf %152, %151 : vector<8x128xf32>
      %154 = math.tanh %153 : vector<8x128xf32>
      %cst_82 = arith.constant 5.000000e-01 : f32
      %155 = vector.broadcast %cst_82 : f32 to vector<8x128xf32>
      %156 = arith.mulf %155, %154 : vector<8x128xf32>
      %cst_83 = arith.constant 5.000000e-01 : f32
      %157 = vector.broadcast %cst_83 : f32 to vector<8x128xf32>
      %158 = arith.addf %156, %157 : vector<8x128xf32>
      %159 = arith.mulf %148, %115 : vector<8x128xf32>
      %160 = arith.mulf %140, %150 : vector<8x128xf32>
      %161 = arith.addf %159, %160 : vector<8x128xf32>
      %162 = math.tanh %161 : vector<8x128xf32>
      %163 = arith.mulf %158, %162 : vector<8x128xf32>
      %164 = arith.truncf %163 : vector<8x128xf32> to vector<8x128xbf16>
      %165 = arith.index_cast %124 : i32 to index
      %c0_84 = arith.constant 0 : index
      %c0_85 = arith.constant 0 : index
      %166 = vector.load %arg15[%165, %c0_84, %c0_85] : memref<8x8x128xbf16, #tpu.memory_space<vmem>>, vector<1x8x128xbf16>
      %167 = vector.shape_cast %166 : vector<1x8x128xbf16> to vector<8x128xbf16>
      %168 = vector.shape_cast %164 : vector<8x128xbf16> to vector<1x8x128xbf16>
      tpu.vector_store %arg15[%165, %c0_84, %c0_85], %168 {strides = array<i32>} : memref<8x8x128xbf16, #tpu.memory_space<vmem>>, vector<1x8x128xbf16>,
      %c4_i32_86 = arith.constant 4 : i32
      %169 = arith.muli %arg16, %c4_i32_86 : i32
      %c3_i32 = arith.constant 3 : i32
      %170 = arith.addi %169, %c3_i32 : i32
      %171 = arith.index_cast %170 : i32 to index
      %c0_87 = arith.constant 0 : index
      %c0_88 = arith.constant 0 : index
      %172 = vector.load %arg14[%171, %c0_87, %c0_88] : memref<8x8x512xbf16, #tpu.memory_space<vmem>>, vector<1x8x512xbf16>
      %173 = vector.shape_cast %172 : vector<1x8x512xbf16> to vector<8x512xbf16>
      %174 = arith.extf %173 : vector<8x512xbf16> to vector<8x512xf32>
      %175 = arith.truncf %163 : vector<8x128xf32> to vector<8x128xbf16>
      %c0_89 = arith.constant 0 : index
      %c0_90 = arith.constant 0 : index
      %176 = vector.load %arg4[%c0_89, %c0_90] : memref<128x512xbf16, #tpu.memory_space<vmem>>, vector<128x512xbf16>
      %cst_91 = arith.constant dense<0.000000e+00> : vector<8x512xf32>
      %177 = tpu.matmul %175, %176, %cst_91 {dimension_numbers = #tpu.dot_dimension_numbers<[1], [0], [0], [1], [0, 0, 1, 1], [], []>} : vector<8x128xbf16>, vector<128x512xbf16>, vector<8x512xf32> -> vector<8x512xf32>
      %178 = arith.addf %174, %177 : vector<8x512xf32>
      %179 = vector.extract_strided_slice %178 {offsets = [0, 0], sizes = [8, 128], strides = [1, 1]} : vector<8x512xf32> to vector<8x128xf32>
      %cst_92 = arith.constant 5.000000e-01 : f32
      %180 = vector.broadcast %cst_92 : f32 to vector<8x128xf32>
      %181 = arith.mulf %180, %179 : vector<8x128xf32>
      %182 = math.tanh %181 : vector<8x128xf32>
      %cst_93 = arith.constant 5.000000e-01 : f32
      %183 = vector.broadcast %cst_93 : f32 to vector<8x128xf32>
      %184 = arith.mulf %183, %182 : vector<8x128xf32>
      %cst_94 = arith.constant 5.000000e-01 : f32
      %185 = vector.broadcast %cst_94 : f32 to vector<8x128xf32>
      %186 = arith.addf %184, %185 : vector<8x128xf32>
      %187 = vector.extract_strided_slice %178 {offsets = [0, 128], sizes = [8, 128], strides = [1, 1]} : vector<8x512xf32> to vector<8x128xf32>
      %cst_95 = arith.constant 5.000000e-01 : f32
      %188 = vector.broadcast %cst_95 : f32 to vector<8x128xf32>
      %189 = arith.mulf %188, %187 : vector<8x128xf32>
      %190 = math.tanh %189 : vector<8x128xf32>
      %cst_96 = arith.constant 5.000000e-01 : f32
      %191 = vector.broadcast %cst_96 : f32 to vector<8x128xf32>
      %192 = arith.mulf %191, %190 : vector<8x128xf32>
      %cst_97 = arith.constant 5.000000e-01 : f32
      %193 = vector.broadcast %cst_97 : f32 to vector<8x128xf32>
      %194 = arith.addf %192, %193 : vector<8x128xf32>
      %195 = vector.extract_strided_slice %178 {offsets = [0, 256], sizes = [8, 128], strides = [1, 1]} : vector<8x512xf32> to vector<8x128xf32>
      %196 = math.tanh %195 : vector<8x128xf32>
      %197 = vector.extract_strided_slice %178 {offsets = [0, 384], sizes = [8, 128], strides = [1, 1]} : vector<8x512xf32> to vector<8x128xf32>
      %cst_98 = arith.constant 5.000000e-01 : f32
      %198 = vector.broadcast %cst_98 : f32 to vector<8x128xf32>
      %199 = arith.mulf %198, %197 : vector<8x128xf32>
      %200 = math.tanh %199 : vector<8x128xf32>
      %cst_99 = arith.constant 5.000000e-01 : f32
      %201 = vector.broadcast %cst_99 : f32 to vector<8x128xf32>
      %202 = arith.mulf %201, %200 : vector<8x128xf32>
      %cst_100 = arith.constant 5.000000e-01 : f32
      %203 = vector.broadcast %cst_100 : f32 to vector<8x128xf32>
      %204 = arith.addf %202, %203 : vector<8x128xf32>
      %205 = arith.mulf %194, %161 : vector<8x128xf32>
      %206 = arith.mulf %186, %196 : vector<8x128xf32>
      %207 = arith.addf %205, %206 : vector<8x128xf32>
      %208 = math.tanh %207 : vector<8x128xf32>
      %209 = arith.mulf %204, %208 : vector<8x128xf32>
      %210 = arith.truncf %209 : vector<8x128xf32> to vector<8x128xbf16>
      %211 = arith.index_cast %170 : i32 to index
      %c0_101 = arith.constant 0 : index
      %c0_102 = arith.constant 0 : index
      %212 = vector.load %arg15[%211, %c0_101, %c0_102] : memref<8x8x128xbf16, #tpu.memory_space<vmem>>, vector<1x8x128xbf16>
      %213 = vector.shape_cast %212 : vector<1x8x128xbf16> to vector<8x128xbf16>
      %214 = vector.shape_cast %210 : vector<8x128xbf16> to vector<1x8x128xbf16>
      tpu.vector_store %arg15[%211, %c0_101, %c0_102], %214 {strides = array<i32>} : memref<8x8x128xbf16, #tpu.memory_space<vmem>>, vector<1x8x128xbf16>,
      scf.yield %209, %207 : vector<8x128xf32>, vector<8x128xf32>
    }
    %c2_i32_15 = arith.constant 2 : i32
    %c0_16 = arith.constant 0 : index
    %c0_17 = arith.constant 0 : index
    %17 = vector.load %arg12[%c0_16, %c0_17] : memref<8x128xf32, #tpu.memory_space<vmem>>, vector<8x128xf32>
    tpu.vector_store %arg12[%c0_16, %c0_17], %16#0 {strides = array<i32>} : memref<8x128xf32, #tpu.memory_space<vmem>>, vector<8x128xf32>,
    %c0_18 = arith.constant 0 : index
    %c0_19 = arith.constant 0 : index
    %18 = vector.load %arg13[%c0_18, %c0_19] : memref<8x128xf32, #tpu.memory_space<vmem>>, vector<8x128xf32>
    tpu.vector_store %arg13[%c0_18, %c0_19], %16#1 {strides = array<i32>} : memref<8x128xf32, #tpu.memory_space<vmem>>, vector<8x128xf32>,
    %c0_20 = arith.constant 0 : index
    %c0_21 = arith.constant 0 : index
    %c0_22 = arith.constant 0 : index
    %19 = vector.load %arg15[%c0_20, %c0_21, %c0_22] : memref<8x8x128xbf16, #tpu.memory_space<vmem>>, vector<8x8x128xbf16>
    %20 = vector.shape_cast %19 : vector<8x8x128xbf16> to vector<64x128xbf16>
    %c0_23 = arith.constant 0 : index
    %c0_24 = arith.constant 0 : index
    %21 = vector.load %arg8[%c0_23, %c0_24] : memref<128x128xbf16, #tpu.memory_space<vmem>>, vector<128x128xbf16>
    %cst_25 = arith.constant dense<0.000000e+00> : vector<64x128xf32>
    %22 = tpu.matmul %20, %21, %cst_25 {dimension_numbers = #tpu.dot_dimension_numbers<[1], [0], [0], [1], [0, 0, 1, 1], [], []>} : vector<64x128xbf16>, vector<128x128xbf16>, vector<64x128xf32> -> vector<64x128xf32>
    %c0_26 = arith.constant 0 : index
    %c0_27 = arith.constant 0 : index
    %23 = vector.load %arg9[%c0_26, %c0_27] : memref<1x128xf32, #tpu.memory_space<vmem>>, vector<1x128xf32>
    %24 = vector.broadcast %23 : vector<1x128xf32> to vector<64x128xf32>
    %25 = arith.addf %22, %24 : vector<64x128xf32>
    %26 = vector.shape_cast %25 : vector<64x128xf32> to vector<8x8x128xf32>
    %c0_28 = arith.constant 0 : index
    %c0_29 = arith.constant 0 : index
    %c0_30 = arith.constant 0 : index
    %27 = vector.load %arg11[%c0_28, %c0_29, %c0_30] : memref<8x8x128xf32, #tpu.memory_space<vmem>>, vector<8x8x128xf32>
    tpu.vector_store %arg11[%c0_28, %c0_29, %c0_30], %26 {strides = array<i32>} : memref<8x8x128xf32, #tpu.memory_space<vmem>>, vector<8x8x128xf32>,
    %c0_i32_31 = arith.constant 0 : i32
    %28 = arith.cmpi eq, %arg1, %c0_i32_31 : i32
    %29 = arith.extui %28 : i1 to i32
    %c0_i32_32 = arith.constant 0 : i32
    %30 = arith.cmpi ne, %29, %c0_i32_32 : i32
    scf.if %30 {
      %c0_33 = arith.constant 0 : index
      %c0_34 = arith.constant 0 : index
      %31 = vector.load %arg12[%c0_33, %c0_34] : memref<8x128xf32, #tpu.memory_space<vmem>>, vector<8x128xf32>
      %32 = arith.truncf %31 : vector<8x128xf32> to vector<8x128xbf16>
      %c0_35 = arith.constant 0 : index
      %c0_36 = arith.constant 0 : index
      %33 = vector.load %arg6[%c0_35, %c0_36] : memref<128x128xbf16, #tpu.memory_space<vmem>>, vector<128x128xbf16>
      %cst_37 = arith.constant dense<0.000000e+00> : vector<8x128xf32>
      %34 = tpu.matmul %32, %33, %cst_37 {dimension_numbers = #tpu.dot_dimension_numbers<[1], [0], [0], [1], [0, 0, 1, 1], [], []>} : vector<8x128xbf16>, vector<128x128xbf16>, vector<8x128xf32> -> vector<8x128xf32>
      %c0_38 = arith.constant 0 : index
      %c0_39 = arith.constant 0 : index
      %35 = vector.load %arg7[%c0_38, %c0_39] : memref<1x128xf32, #tpu.memory_space<vmem>>, vector<1x128xf32>
      %36 = vector.broadcast %35 : vector<1x128xf32> to vector<8x128xf32>
      %37 = arith.addf %34, %36 : vector<8x128xf32>
      %c0_40 = arith.constant 0 : index
      %c0_41 = arith.constant 0 : index
      %38 = vector.load %arg10[%c0_40, %c0_41] : memref<8x128xf32, #tpu.memory_space<vmem>>, vector<8x128xf32>
      tpu.vector_store %arg10[%c0_40, %c0_41], %37 {strides = array<i32>} : memref<8x128xf32, #tpu.memory_space<vmem>>, vector<8x128xf32>,
    } else {
    }
    return
  }
  func.func @transform_0(%arg0: i32, %arg1: i32) -> (i32, i32, i32) {
    %c0_i32 = arith.constant 0 : i32
    %c0_i32_0 = arith.constant 0 : i32
    return %arg1, %arg0, %c0_i32 : i32, i32, i32
  }
  func.func @transform_1(%arg0: i32, %arg1: i32) -> (i32, i32) {
    %c0_i32 = arith.constant 0 : i32
    %c0_i32_0 = arith.constant 0 : i32
    %c0_i32_1 = arith.constant 0 : i32
    return %c0_i32, %c0_i32_0 : i32, i32
  }
  func.func @transform_2(%arg0: i32, %arg1: i32) -> (i32, i32) {
    %c0_i32 = arith.constant 0 : i32
    %c0_i32_0 = arith.constant 0 : i32
    %c0_i32_1 = arith.constant 0 : i32
    return %c0_i32, %c0_i32_0 : i32, i32
  }
  func.func @transform_3(%arg0: i32, %arg1: i32) -> (i32, i32) {
    %c0_i32 = arith.constant 0 : i32
    %c0_i32_0 = arith.constant 0 : i32
    %c0_i32_1 = arith.constant 0 : i32
    return %c0_i32, %c0_i32_0 : i32, i32
  }
  func.func @transform_4(%arg0: i32, %arg1: i32) -> (i32, i32) {
    %c0_i32 = arith.constant 0 : i32
    %c0_i32_0 = arith.constant 0 : i32
    %c0_i32_1 = arith.constant 0 : i32
    return %c0_i32, %c0_i32_0 : i32, i32
  }
  func.func @transform_5(%arg0: i32, %arg1: i32) -> (i32, i32) {
    %c0_i32 = arith.constant 0 : i32
    %c0_i32_0 = arith.constant 0 : i32
    %c0_i32_1 = arith.constant 0 : i32
    return %c0_i32, %c0_i32_0 : i32, i32
  }
  func.func @transform_6(%arg0: i32, %arg1: i32) -> (i32, i32) {
    %c0_i32 = arith.constant 0 : i32
    %c0_i32_0 = arith.constant 0 : i32
    %c0_i32_1 = arith.constant 0 : i32
    return %c0_i32, %c0_i32_0 : i32, i32
  }
  func.func @transform_7(%arg0: i32, %arg1: i32) -> (i32, i32) {
    %c0_i32 = arith.constant 0 : i32
    %c0_i32_0 = arith.constant 0 : i32
    %c0_i32_1 = arith.constant 0 : i32
    return %c0_i32, %c0_i32_0 : i32, i32
  }
  func.func @transform_8(%arg0: i32, %arg1: i32) -> (i32, i32) {
    %c0_i32 = arith.constant 0 : i32
    %c0_i32_0 = arith.constant 0 : i32
    return %arg0, %c0_i32 : i32, i32
  }
  func.func @transform_9(%arg0: i32, %arg1: i32) -> (i32, i32, i32) {
    %c0_i32 = arith.constant 0 : i32
    %c0_i32_0 = arith.constant 0 : i32
    return %arg1, %arg0, %c0_i32 : i32, i32, i32
  }
}

</mosaic_0001>

<bundles_post_ra>
// kernel: lstm_classifier_tagger.1
= control target key start
LH: loop header
LB: loop body
LE: loop exit
PB: predicated region body
PF: predicated region fallthrough
CT: control target
= control target key end

     0   :  { %v2475_v1 = vmov 0   ;;  %vm112_vm0 = vcmask 130048   ;;  %v52_v9 = vlaneseq  ;;  %s3036_s1 = inlined_call_operand.vmem [shape: bf16[16,512], index: 1, kind: input, shape index: {}]   ;;  %s3037_s2 = inlined_call_operand.vmem [shape: bf16[128,512], index: 2, kind: input, shape index: {}]   ;;  %s3038_s4 = inlined_call_operand.vmem [shape: bf16[128,128], index: 4, kind: input, shape index: {}]   ;;  %s3039_s5 = inlined_call_operand.vmem [shape: f32[1,128], index: 5, kind: input, shape index: {}]   ;;  %s3040_s6 = inlined_call_operand.vmem [shape: bf16[128,128], index: 6, kind: input, shape index: {}]   ;;  %s3041_s7 = inlined_call_operand.vmem [shape: f32[1,128], index: 7, kind: input, shape index: {}]   ;;  %s3042_s8 = inlined_call_operand.vmem [shape: f32[8,128], index: 8, kind: output, shape index: {0}]   ;;  %s3043_s9 = inlined_call_operand.vmem [shape: f32[8,8,128], index: 9, kind: output, shape index: {1}]   ;;  %s3044_s0 = inlined_call_operand.vmem [shape: bf16[8,8,16], index: 0, kind: input, shape index: {}]   ;;  %s3045_s3 = inlined_call_operand.vmem [shape: f32[1,512], index: 3, kind: input, shape index: {}]  }
   0x1   :  { %v2333_v0 = vld [vmem:[%s3036_s1 + $0x4] ss:$16 sps:$4 sm:$0xff]   ;;  %157 = vmatprep.mubr.bf16.mxu0 %v2475_v1  ;;  %230 = vmatprep.mubr.bf16.mxu1 %v2475_v1  ;;  %v2335_v2 = vld [vmem:[%s3036_s1 + $0xc] ss:$16 sps:$4 sm:$0xff]   ;;  %v2337_v3 = vld [vmem:[%s3036_s1] ss:$16 sps:$4 sm:$0xff]  }
   0x2   :  { %125 = vmatprep.subr.bf16.mxu0 %v2333_v0  ;;  %v2338_v4 = vld [vmem:[%s3036_s1 + $0x8] ss:$16 sps:$4 sm:$0xff]   ;;  %198 = vmatprep.subr.bf16.mxu1 %v2335_v2  ;;  %v2339_v5 = vld [vmem:[%s3044_s0] sm:$0xff]   ;;  %v2341_v7 = vld [vmem:[%s3044_s0 + $0x10] sm:$0xff]   ;;  %v53_v10 = vshrl.u32 %v52_v9, 7 }
   0x3   :  { %126 = vmatpush1.bf16.msra.mxu0 %v2337_v3  ;;  %199 = vmatpush1.bf16.msra.mxu1 %v2338_v4  ;;  %v2340_v6 = vld [vmem:[%s3044_s0 + $0x8] sm:$0xff]   ;;  %v2342_v8 = vld [vmem:[%s3044_s0 + $0x18] sm:$0xff]   ;;  %v50_v13 = vld [vmem:[%s3045_s3] sm:$0xf]  ;;  %s2608_s0 = smov 0  }
   0x4   :  { %v54_v11 = vsub.s32 0, %v53_v10  ;;  %v62_v12 = vsub.s32 2, %v53_v10  ;;  %v58_v14 = vsub.s32 1, %v53_v10  ;;  %v66_v15 = vsub.s32 3, %v53_v10 }
   0x6   :  { %2016 = vmatmul.mubr.msk.bf16.vlgmr.msra.gmra.mrb[0].mxu0 %vm112_vm0, %v2339_v5  ;;  %2020 = vmatmul.mubr.msk.bf16.vlgmr.msra.gmra.mrb[0].mxu1 %vm112_vm0, %v2339_v5  ;;  %v2564_v16 = vrot.slane %v50_v13, %v54_v11  ;;  %v2566_v17 = vrot.slane %v50_v13, %v62_v12  ;;  %v2568_v18 = vrot.slane %v50_v13, %v58_v14 }
   0x7   :  { %167 = vmatprep.mubr.bf16.mxu0 %v2475_v1  ;;  %240 = vmatprep.mubr.bf16.mxu1 %v2475_v1  ;;  %v2570_v19 = vrot.slane %v50_v13, %v66_v15 }
   0xe   :  { %2017 = vmatmul.mubr.msk.bf16.gmra.mrb[4].mxu0 %vm112_vm0, %v2340_v6  ;;  %2021 = vmatmul.mubr.msk.bf16.gmra.mrb[4].mxu1 %vm112_vm0, %v2340_v6 }
   0xf   :  { %177 = vmatprep.mubr.bf16.mxu0 %v2475_v1  ;;  %250 = vmatprep.mubr.bf16.mxu1 %v2475_v1 }
  0x16   :  { %2018 = vmatmul.mubr.msk.bf16.gmra.mrb[8].mxu0 %vm112_vm0, %v2341_v7  ;;  %2022 = vmatmul.mubr.msk.bf16.gmra.mrb[8].mxu1 %vm112_vm0, %v2341_v7 }
  0x17   :  { %187 = vmatprep.mubr.bf16.mxu0 %v2475_v1  ;;  %260 = vmatprep.mubr.bf16.mxu1 %v2475_v1 }
  0x1e   :  { %2019 = vmatmul.mubr.msk.bf16.gmra.mrb[12].mxu0 %vm112_vm0, %v2342_v8  ;;  %2023 = vmatmul.mubr.msk.bf16.gmra.mrb[12].mxu1 %vm112_vm0, %v2342_v8 }
  0xd9   :  { %v159_v20 = vpop.f32.mrb[0].mxu0  ;;  %v232_v21 = vpop.f32.mrb[0].mxu1 }
  0xda   :  { %v160_v22 = vadd.f32 %v159_v20, %v2564_v16  ;;  %v233_v23 = vadd.f32 %v232_v21, %v2566_v17  ;;  %v161_v24 = vpop.f32.mrb[1].mxu0  ;;  %v234_v25 = vpop.f32.mrb[1].mxu1 }
  0xdb   :  { %v162_v26 = vadd.f32 %v161_v24, %v2568_v18  ;;  %v235_v27 = vadd.f32 %v234_v25, %v2570_v19  ;;  %v163_v28 = vpop.f32.mrb[2].mxu0  ;;  %v236_v29 = vpop.f32.mrb[2].mxu1 }
  0xdc   :  { %v164_v30 = vadd.f32 %v163_v28, %v2564_v16  ;;  %v237_v31 = vadd.f32 %v236_v29, %v2566_v17  ;;  %v165_v32 = vpop.f32.mrb[3].mxu0  ;;  %v238_v33 = vpop.f32.mrb[3].mxu1 }
  0xdd   :  { %v2215_v34 = vpack.c.bf16 %v162_v26, %v160_v22  ;;  %v2216_v35 = vpack.c.bf16 %v235_v27, %v233_v23  ;;  %v166_v36 = vadd.f32 %v165_v32, %v2568_v18  ;;  %v239_v37 = vadd.f32 %v238_v33, %v2570_v19 }
  0xdf   :  { %399 = vst [vmem:[#allocation4] sm:$0xff] %v2215_v34  ;;  %400 = vst [vmem:[#allocation4 + $0x8] sm:$0xff] %v2216_v35  ;;  %v2217_v38 = vpack.c.bf16 %v166_v36, %v164_v30  ;;  %v2218_v39 = vpack.c.bf16 %v239_v37, %v237_v31 }
  0xe1   :  { %401 = vst [vmem:[#allocation4 + $0x10] sm:$0xff] %v2217_v38  ;;  %402 = vst [vmem:[#allocation4 + $0x18] sm:$0xff] %v2218_v39  ;;  %v169_v40 = vpop.f32.mrb[4].mxu0  ;;  %v242_v41 = vpop.f32.mrb[4].mxu1 }
  0xe2   :  { %v170_v42 = vadd.f32 %v169_v40, %v2564_v16  ;;  %v243_v43 = vadd.f32 %v242_v41, %v2566_v17  ;;  %v171_v44 = vpop.f32.mrb[5].mxu0  ;;  %v244_v45 = vpop.f32.mrb[5].mxu1  ;;  %v2604_v40 = vmov 0.0   ;;  %v2606_v41 = vmov 0.0  }
  0xe3   :  { %v172_v46 = vadd.f32 %v171_v44, %v2568_v18  ;;  %v245_v47 = vadd.f32 %v244_v45, %v2570_v19  ;;  %v173_v48 = vpop.f32.mrb[6].mxu0  ;;  %v246_v49 = vpop.f32.mrb[6].mxu1 }
  0xe4   :  { %v174_v50 = vadd.f32 %v173_v48, %v2564_v16  ;;  %v247_v51 = vadd.f32 %v246_v49, %v2566_v17  ;;  %v175_v52 = vpop.f32.mrb[7].mxu0  ;;  %v248_v53 = vpop.f32.mrb[7].mxu1 }
  0xe5   :  { %v2219_v54 = vpack.c.bf16 %v172_v46, %v170_v42  ;;  %v2220_v55 = vpack.c.bf16 %v245_v47, %v243_v43  ;;  %v176_v56 = vadd.f32 %v175_v52, %v2568_v18  ;;  %v249_v57 = vadd.f32 %v248_v53, %v2570_v19 }
  0xe7   :  { %403 = vst [vmem:[#allocation4 + $0x20] sm:$0xff] %v2219_v54  ;;  %404 = vst [vmem:[#allocation4 + $0x28] sm:$0xff] %v2220_v55  ;;  %v2221_v58 = vpack.c.bf16 %v176_v56, %v174_v50  ;;  %v2222_v59 = vpack.c.bf16 %v249_v57, %v247_v51 }
  0xe9   :  { %405 = vst [vmem:[#allocation4 + $0x30] sm:$0xff] %v2221_v58  ;;  %406 = vst [vmem:[#allocation4 + $0x38] sm:$0xff] %v2222_v59  ;;  %v179_v60 = vpop.f32.mrb[8].mxu0  ;;  %v252_v61 = vpop.f32.mrb[8].mxu1 }
  0xea   :  { %v180_v62 = vadd.f32 %v179_v60, %v2564_v16  ;;  %v253_v63 = vadd.f32 %v252_v61, %v2566_v17  ;;  %v181_v0 = vpop.f32.mrb[9].mxu0  ;;  %v254_v1 = vpop.f32.mrb[9].mxu1 }
  0xeb   :  { %v182_v2 = vadd.f32 %v181_v0, %v2568_v18  ;;  %v255_v3 = vadd.f32 %v254_v1, %v2570_v19  ;;  %v183_v4 = vpop.f32.mrb[10].mxu0  ;;  %v256_v5 = vpop.f32.mrb[10].mxu1 }
  0xec   :  { %v184_v6 = vadd.f32 %v183_v4, %v2564_v16  ;;  %v257_v7 = vadd.f32 %v256_v5, %v2566_v17  ;;  %v185_v8 = vpop.f32.mrb[11].mxu0  ;;  %v258_v9 = vpop.f32.mrb[11].mxu1 }
  0xed   :  { %v2223_v10 = vpack.c.bf16 %v182_v2, %v180_v62  ;;  %v2224_v11 = vpack.c.bf16 %v255_v3, %v253_v63  ;;  %v186_v12 = vadd.f32 %v185_v8, %v2568_v18  ;;  %v259_v13 = vadd.f32 %v258_v9, %v2570_v19 }
  0xef   :  { %407 = vst [vmem:[#allocation4 + $0x40] sm:$0xff] %v2223_v10  ;;  %408 = vst [vmem:[#allocation4 + $0x48] sm:$0xff] %v2224_v11  ;;  %v2225_v14 = vpack.c.bf16 %v186_v12, %v184_v6  ;;  %v2226_v15 = vpack.c.bf16 %v259_v13, %v257_v7 }
  0xf1   :  { %409 = vst [vmem:[#allocation4 + $0x50] sm:$0xff] %v2225_v14  ;;  %410 = vst [vmem:[#allocation4 + $0x58] sm:$0xff] %v2226_v15  ;;  %v189_v20 = vpop.f32.mrb[12].mxu0  ;;  %v262_v21 = vpop.f32.mrb[12].mxu1 }
  0xf2   :  { %v190_v22 = vadd.f32 %v189_v20, %v2564_v16  ;;  %v263_v23 = vadd.f32 %v262_v21, %v2566_v17  ;;  %v191_v24 = vpop.f32.mrb[13].mxu0  ;;  %v264_v25 = vpop.f32.mrb[13].mxu1 }
  0xf3   :  { %v192_v26 = vadd.f32 %v191_v24, %v2568_v18  ;;  %v265_v27 = vadd.f32 %v264_v25, %v2570_v19  ;;  %v193_v28 = vpop.f32.mrb[14].mxu0  ;;  %v266_v29 = vpop.f32.mrb[14].mxu1 }
  0xf4   :  { %v194_v30 = vadd.f32 %v193_v28, %v2564_v16  ;;  %v267_v31 = vadd.f32 %v266_v29, %v2566_v17  ;;  %v195_v32 = vpop.f32.mrb[15].mxu0  ;;  %v268_v33 = vpop.f32.mrb[15].mxu1 }
  0xf5   :  { %v2227_v34 = vpack.c.bf16 %v192_v26, %v190_v22  ;;  %v2228_v35 = vpack.c.bf16 %v265_v27, %v263_v23  ;;  %v196_v36 = vadd.f32 %v195_v32, %v2568_v18  ;;  %v269_v37 = vadd.f32 %v268_v33, %v2570_v19 }
  0xf7   :  { %411 = vst [vmem:[#allocation4 + $0x60] sm:$0xff] %v2227_v34  ;;  %412 = vst [vmem:[#allocation4 + $0x68] sm:$0xff] %v2228_v35  ;;  %v2229_v38 = vpack.c.bf16 %v196_v36, %v194_v30  ;;  %v2230_v39 = vpack.c.bf16 %v269_v37, %v267_v31 }
  0xf9   :  { %413 = vst [vmem:[#allocation4 + $0x70] sm:$0xff] %v2229_v38  ;;  %414 = vst [vmem:[#allocation4 + $0x78] sm:$0xff] %v2230_v39 }
  0xfa LB: > { %v2622_v16 = vld [vmem:[%s3037_s2 + $0x4] ss:$16 sps:$4 sm:$0xff]   ;;  %v2627_v17 = vld [vmem:[%s3037_s2] ss:$16 sps:$4 sm:$0xff]   ;;  %v2476_v18 = vmov 0   ;;  %v435_v6 = vpack.c.bf16 %v2469_v41, %v2469_v41  ;;  %s2232_s21 = sshll.u32 %s2473_s0, 6  ;;  %s2473_s0 = sphi %s2608_s0, %s422_s0   ;;  %v2469_v41 = vphi %v2606_v41, %v1661_v41   ;;  %v2465_v40 = vphi %v2604_v40, %v1659_v40  }
  0xfb   : > { %660 = vmatprep.mubr.bf16.mxu0 %v2476_v18  ;;  %701 = vmatprep.mubr.bf16.mxu1 %v2476_v18  ;;  %v2635_v19 = vld [vmem:[%s3037_s2 + $0x24] ss:$16 sps:$4 sm:$0xff]   ;;  %v2641_v42 = vld [vmem:[%s3037_s2 + $0xc] ss:$16 sps:$4 sm:$0xff]   ;;  %v2646_v43 = vld [vmem:[%s3037_s2 + $0x20] ss:$16 sps:$4 sm:$0xff]  }
  0xfc   : > { %628 = vmatprep.subr.bf16.mxu0 %v2622_v16  ;;  %v2651_v44 = vld [vmem:[%s3037_s2 + $0x8] ss:$16 sps:$4 sm:$0xff]   ;;  %v2657_v45 = vld [vmem:[%s3037_s2 + $0x44] ss:$16 sps:$4 sm:$0xff]   ;;  %669 = vmatprep.subr.bf16.mxu1 %v2641_v42  ;;  %v2663_v46 = vld [vmem:[%s3037_s2 + $0x2c] ss:$16 sps:$4 sm:$0xff]  }
  0xfd   : > { %629 = vmatpush1.bf16.msra.mxu0 %v2627_v17  ;;  %670 = vmatpush1.bf16.msra.mxu1 %v2651_v44  ;;  %v2669_v47 = vld [vmem:[%s3037_s2 + $0x28] ss:$16 sps:$4 sm:$0xff]   ;;  %v2676_v48 = vld [vmem:[%s3037_s2 + $0x40] ss:$16 sps:$4 sm:$0xff]   ;;  %v2682_v49 = vld [vmem:[%s3037_s2 + $0x64] ss:$16 sps:$4 sm:$0xff]  }
  0xfe   : > { %630 = vmatprep.subr.bf16.mxu0 %v2635_v19  ;;  %671 = vmatprep.subr.bf16.mxu1 %v2663_v46  ;;  %v2687_v50 = vld [vmem:[%s3037_s2 + $0x4c] ss:$16 sps:$4 sm:$0xff]   ;;  %v2693_v51 = vld [vmem:[%s3037_s2 + $0x48] ss:$16 sps:$4 sm:$0xff]   ;;  %v2700_v52 = vld [vmem:[%s3037_s2 + $0x60] ss:$16 sps:$4 sm:$0xff]  }
  0xff   : > { %v2705_v53 = vld [vmem:[%s3037_s2 + $0x6c] ss:$16 sps:$4 sm:$0xff]   ;;  %v2711_v54 = vld [vmem:[%s3037_s2 + $0x84] ss:$16 sps:$4 sm:$0xff]   ;;  %v2717_v55 = vld [vmem:[%s3037_s2 + $0x80] ss:$16 sps:$4 sm:$0xff]  }
 0x100   : > { %v2722_v56 = vld [vmem:[%s3037_s2 + $0x68] ss:$16 sps:$4 sm:$0xff]   ;;  %v2729_v57 = vld [vmem:[%s3037_s2 + $0x8c] ss:$16 sps:$4 sm:$0xff]   ;;  %v2735_v58 = vld [vmem:[%s3037_s2 + $0xa4] ss:$16 sps:$4 sm:$0xff]  }
 0x101   : > { %631 = vmatpush1.bf16.msra.mxu0 %v2646_v43  ;;  %672 = vmatpush1.bf16.msra.mxu1 %v2669_v47  ;;  %v2741_v59 = vld [vmem:[%s3037_s2 + $0x88] ss:$16 sps:$4 sm:$0xff]   ;;  %v2748_v60 = vld [vmem:[%s3037_s2 + $0xa0] ss:$16 sps:$4 sm:$0xff]   ;;  %v2753_v61 = vld [vmem:[%s3037_s2 + $0xac] ss:$16 sps:$4 sm:$0xff]  }
 0x102   : > { %632 = vmatprep.subr.bf16.mxu0 %v2657_v45  ;;  %673 = vmatprep.subr.bf16.mxu1 %v2687_v50  ;;  %v2759_v62 = vld [vmem:[%s3037_s2 + $0xc4] ss:$16 sps:$4 sm:$0xff]   ;;  %v2765_v63 = vld [vmem:[%s3037_s2 + $0xa8] ss:$16 sps:$4 sm:$0xff]   ;;  %v2772_v0 = vld [vmem:[%s3037_s2 + $0xc0] ss:$16 sps:$4 sm:$0xff]  }
 0x103   : > { %v2777_v1 = vld [vmem:[%s3037_s2 + $0xcc] ss:$16 sps:$4 sm:$0xff]   ;;  %v2783_v2 = vld [vmem:[%s3037_s2 + $0xe4] ss:$16 sps:$4 sm:$0xff]   ;;  %v2789_v3 = vld [vmem:[%s3037_s2 + $0xc8] ss:$16 sps:$4 sm:$0xff]  }
 0x104   : > { %v2796_v4 = vld [vmem:[%s3037_s2 + $0xe0] ss:$16 sps:$4 sm:$0xff]   ;;  %v2801_v5 = vld [vmem:[%s3037_s2 + $0xec] ss:$16 sps:$4 sm:$0xff]   ;;  %v2810_v7 = vld [vmem:[%s3037_s2 + $0xe8] ss:$16 sps:$4 sm:$0xff]  }
 0x105   : > { %633 = vmatpush1.bf16.msra.mxu0 %v2676_v48  ;;  %674 = vmatpush1.bf16.msra.mxu1 %v2693_v51  ;;  %s2852_s22 = scalar_lea.vmem [#allocation4], %s2232_s21  ;;  %s2233_s23 = sshll.u32 %s2473_s0, 4 }
 0x106   : > { %634 = vmatprep.subr.bf16.mxu0 %v2682_v49  ;;  %675 = vmatprep.subr.bf16.mxu1 %v2705_v53  ;;  %v429_v8 = vld [vmem:[%s2852_s22] sm:$0xff]  ;;  %v430_v10 = vld [vmem:[%s2852_s22 + $0x8] sm:$0xff]  ;;  %s2861_s24 = scalar_lea.vmem [#allocation5], %s2233_s23  ;;  %s422_s0 = sadd.s32 1, %s2473_s0  }
 0x107   : > { %v431_v9 = vunpack.c.l.bf16 %v429_v8  ;;  %v432_v11 = vunpack.c.h.bf16 %v429_v8  ;;  %v433_v13 = vunpack.c.l.bf16 %v430_v10  ;;  %v434_v28 = vunpack.c.h.bf16 %v430_v10  ;;  %p419_p0 = scmp.ge.s32.totalorder %s422_s0, 2  }
 0x108   :  { %vm2478_vm1 = vmmov (%p419_p0), 0  }
 0x109   : > { %635 = vmatpush1.bf16.msra.mxu0 %v2700_v52  ;;  %676 = vmatpush1.bf16.msra.mxu1 %v2722_v56 }
 0x10a   : > { %636 = vmatprep.subr.bf16.mxu0 %v2711_v54  ;;  %677 = vmatprep.subr.bf16.mxu1 %v2729_v57 }
 0x10d   : > { %637 = vmatpush1.bf16.msra.mxu0 %v2717_v55  ;;  %678 = vmatpush1.bf16.msra.mxu1 %v2741_v59 }
 0x10e   : > { %638 = vmatprep.subr.bf16.mxu0 %v2735_v58  ;;  %679 = vmatprep.subr.bf16.mxu1 %v2753_v61 }
 0x111   : > { %639 = vmatpush1.bf16.msra.mxu0 %v2748_v60  ;;  %680 = vmatpush1.bf16.msra.mxu1 %v2765_v63 }
 0x112   : > { %640 = vmatprep.subr.bf16.mxu0 %v2759_v62  ;;  %681 = vmatprep.subr.bf16.mxu1 %v2777_v1 }
 0x115   : > { %641 = vmatpush1.bf16.msra.mxu0 %v2772_v0  ;;  %682 = vmatpush1.bf16.msra.mxu1 %v2789_v3 }
 0x116   : > { %642 = vmatprep.subr.bf16.mxu0 %v2783_v2  ;;  %683 = vmatprep.subr.bf16.mxu1 %v2801_v5 }
 0x119   : > { %643 = vmatpush1.bf16.msra.mxu0 %v2796_v4  ;;  %684 = vmatpush1.bf16.msra.mxu1 %v2810_v7 }
 0x11a   : > { %938 = vmatprep.subr.bf16.mxu0 %v2622_v16  ;;  %979 = vmatprep.subr.bf16.mxu1 %v2641_v42 }
 0x11c   : > { %661 = vmatmul.mubr.bf16.vlgmr.msra.gmra.mrb[0].mxu0 %v435_v6  ;;  %702 = vmatmul.mubr.bf16.vlgmr.msra.gmra.mrb[0].mxu1 %v435_v6 }
 0x11d   : > { %939 = vmatpush1.bf16.msra.mxu0 %v2627_v17  ;;  %970 = vmatprep.mubr.bf16.mxu0 %v2476_v18 }
 0x11e   : > { %940 = vmatprep.subr.bf16.mxu0 %v2635_v19  ;;  %980 = vmatpush1.bf16.msra.mxu1 %v2651_v44 }
 0x11f   : > { %1011 = vmatprep.mubr.bf16.mxu1 %v2476_v18  ;;  %981 = vmatprep.subr.bf16.mxu1 %v2663_v46 }
 0x121   : > { %941 = vmatpush1.bf16.msra.mxu0 %v2646_v43 }
 0x122   : > { %942 = vmatprep.subr.bf16.mxu0 %v2657_v45  ;;  %982 = vmatpush1.bf16.msra.mxu1 %v2669_v47 }
 0x123   : > { %983 = vmatprep.subr.bf16.mxu1 %v2687_v50 }
 0x125   : > { %943 = vmatpush1.bf16.msra.mxu0 %v2676_v48 }
 0x126   : > { %944 = vmatprep.subr.bf16.mxu0 %v2682_v49  ;;  %984 = vmatpush1.bf16.msra.mxu1 %v2693_v51 }
 0x127   : > { %985 = vmatprep.subr.bf16.mxu1 %v2705_v53 }
 0x129   : > { %945 = vmatpush1.bf16.msra.mxu0 %v2700_v52 }
 0x12a   : > { %946 = vmatprep.subr.bf16.mxu0 %v2711_v54  ;;  %986 = vmatpush1.bf16.msra.mxu1 %v2722_v56 }
 0x12b   : > { %987 = vmatprep.subr.bf16.mxu1 %v2729_v57 }
 0x12d   : > { %947 = vmatpush1.bf16.msra.mxu0 %v2717_v55 }
 0x12e   : > { %948 = vmatprep.subr.bf16.mxu0 %v2735_v58  ;;  %988 = vmatpush1.bf16.msra.mxu1 %v2741_v59 }
 0x12f   : > { %989 = vmatprep.subr.bf16.mxu1 %v2753_v61 }
 0x131   : > { %949 = vmatpush1.bf16.msra.mxu0 %v2748_v60 }
 0x132   : > { %950 = vmatprep.subr.bf16.mxu0 %v2759_v62  ;;  %990 = vmatpush1.bf16.msra.mxu1 %v2765_v63 }
 0x133   : > { %991 = vmatprep.subr.bf16.mxu1 %v2777_v1 }
 0x135   : > { %951 = vmatpush1.bf16.msra.mxu0 %v2772_v0 }
 0x136   : > { %952 = vmatprep.subr.bf16.mxu0 %v2783_v2  ;;  %992 = vmatpush1.bf16.msra.mxu1 %v2789_v3 }
 0x137   : > { %993 = vmatprep.subr.bf16.mxu1 %v2801_v5 }
 0x139   : > { %953 = vmatpush1.bf16.msra.mxu0 %v2796_v4 }
 0x13a   : > { %1248 = vmatprep.subr.bf16.mxu0 %v2622_v16  ;;  %994 = vmatpush1.bf16.msra.mxu1 %v2810_v7 }
 0x13b   : > { %1289 = vmatprep.subr.bf16.mxu1 %v2641_v42 }
 0x1ef   : > { %v662_v12 = vpop.f32.mrb[0].mxu0  ;;  %v703_v24 = vpop.f32.mrb[0].mxu1 }
 0x1f0   : > { %v710_v14 = vadd.f32 %v662_v12, %v431_v9  ;;  %v664_v15 = vpop.f32.mrb[1].mxu0  ;;  %v712_v26 = vadd.f32 %v703_v24, %v433_v13  ;;  %v705_v27 = vpop.f32.mrb[1].mxu1 }
 0x1f1   : > { %v711_v20 = vadd.f32 %v664_v15, %v432_v11  ;;  %v666_v21 = vpop.f32.mrb[2].mxu0  ;;  %v707_v29 = vpop.f32.mrb[2].mxu1  ;;  %v713_v31 = vadd.f32 %v705_v27, %v434_v28 }
 0x1f2   : > { %v714_v22 = vmul.f32 0.5, %v710_v14  ;;  %v667_v23 = vpop.f32.mrb[3].mxu0  ;;  %v708_v30 = vpop.f32.mrb[3].mxu1 }
 0x1f3   : > { %v718_v25 = vmul.f32 0.5, %v711_v20  ;;  %v723_v32 = vmul.f32 0.5, %v713_v31  ;;  %v2079_v20 = vld [vmem:[%s2852_s22 + $0x18] sm:$0xff] }
 0x1f4   : > { %2391 = vtanh.f32 %v714_v22 }
 0x1f5   : > { %2393 = vtanh.f32 %v718_v25  ;;  %v744_v25 = vunpack.c.l.bf16 %v2079_v20 }
 0x1f6   : > { %2395 = vtanh.f32 %v712_v26 }
 0x1f7   : > { %2397 = vtanh.f32 %v723_v32 }
 0x1fe   : > { %v2392_v33 = vpop.eup %2391 }
 0x1ff   : > { %v2394_v34 = vpop.eup %2393  ;;  %v716_v35 = vmul.f32 0.5, %v2392_v33 }
 0x200   : > { %v2396_v36 = vpop.eup %2395  ;;  %v720_v37 = vmul.f32 0.5, %v2394_v34 }
 0x201   : > { %v717_v38 = vadd.f32 0.5, %v716_v35  ;;  %v2398_v9 = vpop.eup %2397 }
 0x202   : > { %v721_v39 = vadd.f32 0.5, %v720_v37  ;;  %v725_v10 = vmul.f32 0.5, %v2398_v9 }
 0x203   : > { %v728_v41 = vmul.f32 %v2396_v36, %v717_v38 }
 0x204   : > { %v727_v6 = vmul.f32 %v2465_v40, %v721_v39  ;;  %v726_v11 = vadd.f32 0.5, %v725_v10  ;;  %v2078_v40 = vld [vmem:[%s2852_s22 + $0x10] sm:$0xff] }
 0x205   : > { %v742_v15 = vunpack.c.l.bf16 %v2078_v40  ;;  %v743_v21 = vunpack.c.h.bf16 %v2078_v40 }
 0x206   : > { %v2857_v8 = vadd.f32 %v728_v41, %v727_v6 }
 0x208   : > { %2399 = vtanh.f32 %v2857_v8 }
 0x212   : > { %v2400_v12 = vpop.eup %2399 }
 0x213   : > { %v731_v13 = vmul.f32 %v2400_v12, %v726_v11 }
 0x215   : > { %v732_v14 = vpack.c.bf16 %v731_v13, %v731_v13 }
 0x217   : > { %735 = vst [vmem:[%s2861_s24] sm:$0xf] %v732_v14  ;;  %971 = vmatmul.mubr.bf16.vlgmr.msra.gmra.mrb[4].mxu0 %v732_v14  ;;  %1012 = vmatmul.mubr.bf16.vlgmr.msra.gmra.mrb[4].mxu1 %v732_v14 }
 0x218   : > { %1249 = vmatpush1.bf16.msra.mxu0 %v2627_v17  ;;  %1290 = vmatpush1.bf16.msra.mxu1 %v2651_v44 }
 0x219   : > { %1250 = vmatprep.subr.bf16.mxu0 %v2635_v19  ;;  %1291 = vmatprep.subr.bf16.mxu1 %v2663_v46 }
 0x21a   : > { %1280 = vmatprep.mubr.bf16.mxu0 %v2476_v18  ;;  %1321 = vmatprep.mubr.bf16.mxu1 %v2476_v18 }
 0x21c   : > { %1251 = vmatpush1.bf16.msra.mxu0 %v2646_v43  ;;  %1292 = vmatpush1.bf16.msra.mxu1 %v2669_v47 }
 0x21d   : > { %1252 = vmatprep.subr.bf16.mxu0 %v2657_v45  ;;  %1293 = vmatprep.subr.bf16.mxu1 %v2687_v50 }
 0x220   : > { %1253 = vmatpush1.bf16.msra.mxu0 %v2676_v48  ;;  %1294 = vmatpush1.bf16.msra.mxu1 %v2693_v51 }
 0x221   : > { %1254 = vmatprep.subr.bf16.mxu0 %v2682_v49  ;;  %1295 = vmatprep.subr.bf16.mxu1 %v2705_v53 }
 0x224   : > { %1255 = vmatpush1.bf16.msra.mxu0 %v2700_v52  ;;  %1296 = vmatpush1.bf16.msra.mxu1 %v2722_v56 }
 0x225   : > { %1256 = vmatprep.subr.bf16.mxu0 %v2711_v54  ;;  %1297 = vmatprep.subr.bf16.mxu1 %v2729_v57 }
 0x228   : > { %1257 = vmatpush1.bf16.msra.mxu0 %v2717_v55  ;;  %1298 = vmatpush1.bf16.msra.mxu1 %v2741_v59 }
 0x229   : > { %1258 = vmatprep.subr.bf16.mxu0 %v2735_v58  ;;  %1299 = vmatprep.subr.bf16.mxu1 %v2753_v61 }
 0x22c   : > { %1259 = vmatpush1.bf16.msra.mxu0 %v2748_v60  ;;  %1300 = vmatpush1.bf16.msra.mxu1 %v2765_v63 }
 0x22d   : > { %1260 = vmatprep.subr.bf16.mxu0 %v2759_v62  ;;  %1301 = vmatprep.subr.bf16.mxu1 %v2777_v1 }
 0x230   : > { %1261 = vmatpush1.bf16.msra.mxu0 %v2772_v0  ;;  %1302 = vmatpush1.bf16.msra.mxu1 %v2789_v3 }
 0x231   : > { %1262 = vmatprep.subr.bf16.mxu0 %v2783_v2  ;;  %1303 = vmatprep.subr.bf16.mxu1 %v2801_v5 }
 0x234   : > { %1263 = vmatpush1.bf16.msra.mxu0 %v2796_v4  ;;  %1304 = vmatpush1.bf16.msra.mxu1 %v2810_v7 }
 0x235   : > { %1558 = vmatprep.subr.bf16.mxu0 %v2622_v16  ;;  %1599 = vmatprep.subr.bf16.mxu1 %v2641_v42  ;;  %v745_v42 = vunpack.c.h.bf16 %v2079_v20 }
 0x2ea   : > { %v972_v22 = vpop.f32.mrb[4].mxu0  ;;  %v1013_v23 = vpop.f32.mrb[4].mxu1 }
 0x2eb   : > { %v1020_v24 = vadd.f32 %v972_v22, %v742_v15  ;;  %v974_v26 = vpop.f32.mrb[5].mxu0  ;;  %v1015_v27 = vpop.f32.mrb[5].mxu1  ;;  %v1022_v16 = vadd.f32 %v1013_v23, %v744_v25 }
 0x2ec   : > { %v1021_v28 = vadd.f32 %v974_v26, %v743_v21  ;;  %v976_v29 = vpop.f32.mrb[6].mxu0  ;;  %v1017_v30 = vpop.f32.mrb[6].mxu1  ;;  %v1023_v35 = vadd.f32 %v1015_v27, %v745_v42 }
 0x2ed   : > { %v1024_v31 = vmul.f32 0.5, %v1020_v24  ;;  %v977_v32 = vpop.f32.mrb[7].mxu0  ;;  %v1018_v33 = vpop.f32.mrb[7].mxu1  ;;  %v2157_v30 = vld [vmem:[%s2852_s22 + $0x38] sm:$0xff] }
 0x2ee   : > { %v1028_v34 = vmul.f32 0.5, %v1021_v28  ;;  %v1033_v36 = vmul.f32 0.5, %v1023_v35  ;;  %v2156_v28 = vld [vmem:[%s2852_s22 + $0x30] sm:$0xff] }
 0x2ef   : > { %2401 = vtanh.f32 %v1024_v31  ;;  %v1362_v29 = vunpack.c.l.bf16 %v2156_v28  ;;  %v1363_v31 = vunpack.c.h.bf16 %v2156_v28 }
 0x2f0   : > { %2403 = vtanh.f32 %v1028_v34 }
 0x2f1   : > { %2405 = vtanh.f32 %v1022_v16  ;;  %v1364_v16 = vunpack.c.l.bf16 %v2157_v30 }
 0x2f2   : > { %2407 = vtanh.f32 %v1033_v36 }
 0x2f9   : > { %v2402_v37 = vpop.eup %2401 }
 0x2fa   : > { %v2404_v38 = vpop.eup %2403  ;;  %v1026_v39 = vmul.f32 0.5, %v2402_v37 }
 0x2fb   : > { %v1030_v41 = vmul.f32 0.5, %v2404_v38  ;;  %v2406_v9 = vpop.eup %2405 }
 0x2fc   : > { %v1027_v6 = vadd.f32 0.5, %v1026_v39  ;;  %v2408_v14 = vpop.eup %2407 }
 0x2fd   : > { %v1031_v10 = vadd.f32 0.5, %v1030_v41  ;;  %v1035_v40 = vmul.f32 0.5, %v2408_v14 }
 0x2fe   : > { %v1038_v11 = vmul.f32 %v2406_v9, %v1027_v6 }
 0x2ff   : > { %v1037_v12 = vmul.f32 %v1031_v10, %v2857_v8  ;;  %v1036_v15 = vadd.f32 0.5, %v1035_v40 }
 0x301   : > { %v2901_v13 = vadd.f32 %v1038_v11, %v1037_v12  ;;  %v1365_v11 = vunpack.c.h.bf16 %v2157_v30 }
 0x303   : > { %2409 = vtanh.f32 %v2901_v13 }
 0x30d   : > { %v2410_v20 = vpop.eup %2409 }
 0x30e   : > { %v1041_v21 = vmul.f32 %v2410_v20, %v1036_v15 }
 0x310   : > { %v1042_v22 = vpack.c.bf16 %v1041_v21, %v1041_v21 }
 0x312   : > { %2114 = vst [vmem:[%s2861_s24 + $0x4] sm:$0xf] %v1042_v22  ;;  %1281 = vmatmul.mubr.bf16.vlgmr.msra.gmra.mrb[8].mxu0 %v1042_v22  ;;  %1322 = vmatmul.mubr.bf16.vlgmr.msra.gmra.mrb[8].mxu1 %v1042_v22 }
 0x313   : > { %1559 = vmatpush1.bf16.msra.mxu0 %v2627_v17  ;;  %1600 = vmatpush1.bf16.msra.mxu1 %v2651_v44  ;;  %v2117_v17 = vld [vmem:[%s2852_s22 + $0x20] sm:$0xff] }
 0x314   : > { %1560 = vmatprep.subr.bf16.mxu0 %v2635_v19  ;;  %1601 = vmatprep.subr.bf16.mxu1 %v2663_v46  ;;  %v2118_v19 = vld [vmem:[%s2852_s22 + $0x28] sm:$0xff] }
 0x315   : > { %1590 = vmatprep.mubr.bf16.mxu0 %v2476_v18  ;;  %1631 = vmatprep.mubr.bf16.mxu1 %v2476_v18  ;;  %v1052_v18 = vunpack.c.l.bf16 %v2117_v17 }
 0x317   : > { %1561 = vmatpush1.bf16.msra.mxu0 %v2646_v43  ;;  %1602 = vmatpush1.bf16.msra.mxu1 %v2669_v47  ;;  %v1053_v43 = vunpack.c.h.bf16 %v2117_v17  ;;  %v1054_v47 = vunpack.c.l.bf16 %v2118_v19 }
 0x318   : > { %1562 = vmatprep.subr.bf16.mxu0 %v2657_v45  ;;  %1603 = vmatprep.subr.bf16.mxu1 %v2687_v50 }
 0x31b   : > { %1563 = vmatpush1.bf16.msra.mxu0 %v2676_v48  ;;  %1604 = vmatpush1.bf16.msra.mxu1 %v2693_v51 }
 0x31c   : > { %1564 = vmatprep.subr.bf16.mxu0 %v2682_v49  ;;  %1605 = vmatprep.subr.bf16.mxu1 %v2705_v53 }
 0x31f   : > { %1565 = vmatpush1.bf16.msra.mxu0 %v2700_v52  ;;  %1606 = vmatpush1.bf16.msra.mxu1 %v2722_v56 }
 0x320   : > { %1566 = vmatprep.subr.bf16.mxu0 %v2711_v54  ;;  %1607 = vmatprep.subr.bf16.mxu1 %v2729_v57 }
 0x323   : > { %1567 = vmatpush1.bf16.msra.mxu0 %v2717_v55  ;;  %1608 = vmatpush1.bf16.msra.mxu1 %v2741_v59 }
 0x324   : > { %1568 = vmatprep.subr.bf16.mxu0 %v2735_v58  ;;  %1609 = vmatprep.subr.bf16.mxu1 %v2753_v61  ;;  %v1055_v58 = vunpack.c.h.bf16 %v2118_v19 }
 0x327   : > { %1569 = vmatpush1.bf16.msra.mxu0 %v2748_v60  ;;  %1610 = vmatpush1.bf16.msra.mxu1 %v2765_v63 }
 0x328   : > { %1570 = vmatprep.subr.bf16.mxu0 %v2759_v62  ;;  %1611 = vmatprep.subr.bf16.mxu1 %v2777_v1 }
 0x32b   : > { %1571 = vmatpush1.bf16.msra.mxu0 %v2772_v0  ;;  %1612 = vmatpush1.bf16.msra.mxu1 %v2789_v3 }
 0x32c   : > { %1572 = vmatprep.subr.bf16.mxu0 %v2783_v2  ;;  %1613 = vmatprep.subr.bf16.mxu1 %v2801_v5 }
 0x32f   : > { %1573 = vmatpush1.bf16.msra.mxu0 %v2796_v4  ;;  %1614 = vmatpush1.bf16.msra.mxu1 %v2810_v7 }
 0x3e5   : > { %v1282_v44 = vpop.f32.mrb[8].mxu0  ;;  %v1323_v45 = vpop.f32.mrb[8].mxu1 }
 0x3e6   : > { %v1330_v46 = vadd.f32 %v1282_v44, %v1052_v18  ;;  %v1284_v48 = vpop.f32.mrb[9].mxu0  ;;  %v1325_v49 = vpop.f32.mrb[9].mxu1  ;;  %v1332_v57 = vadd.f32 %v1323_v45, %v1054_v47 }
 0x3e7   : > { %v1331_v50 = vadd.f32 %v1284_v48, %v1053_v43  ;;  %v1286_v51 = vpop.f32.mrb[10].mxu0  ;;  %v1327_v52 = vpop.f32.mrb[10].mxu1  ;;  %v1333_v59 = vadd.f32 %v1325_v49, %v1055_v58  ;;  %v2431_v48 = vld [vmem:[%s3040_s6] sm:$0xff] (%p419_p0)   ;;  %v2477_v49 = vmov (%p419_p0), 0.0  }
 0x3e8   : > { %v1334_v53 = vmul.f32 0.5, %v1330_v46  ;;  %v1287_v54 = vpop.f32.mrb[11].mxu0  ;;  %v1328_v55 = vpop.f32.mrb[11].mxu1  ;;  %2285 = vmatprep.subr.bf16.mxu1 (%p419_p0), %v2477_v49  ;;  %2261 = vmatprep.subr.bf16.mxu0 (%p419_p0), %v2431_v48  ;;  %v2434_v51 = vld [vmem:[%s3038_s4] sm:$0xff] (%p419_p0)   ;;  %v2433_v52 = vld [vmem:[%s3040_s6 + $0x10] sm:$0xff] (%p419_p0)  }
 0x3e9   : > { %v1338_v56 = vmul.f32 0.5, %v1331_v50  ;;  %v1343_v60 = vmul.f32 0.5, %v1333_v59  ;;  %v2432_v50 = vld [vmem:[%s3040_s6 + $0x8] sm:$0xff] (%p419_p0)   ;;  %v2435_v54 = vld [vmem:[%s3040_s6 + $0x18] sm:$0xff] (%p419_p0)   ;;  %v2438_v55 = vld [vmem:[%s3038_s4 + $0x10] sm:$0xff] (%p419_p0)  }
 0x3ea   : > { %2411 = vtanh.f32 %v1334_v53  ;;  %v2436_v53 = vld [vmem:[%s3038_s4 + $0x8] sm:$0xff] (%p419_p0)  }
 0x3eb   : > { %2413 = vtanh.f32 %v1338_v56  ;;  %v2437_v56 = vld [vmem:[%s3040_s6 + $0x20] sm:$0xff] (%p419_p0)   ;;  %v2439_v59 = vld [vmem:[%s3040_s6 + $0x28] sm:$0xff] (%p419_p0)  }
 0x3ec   : > { %2415 = vtanh.f32 %v1332_v57  ;;  %v2440_v57 = vld [vmem:[%s3038_s4 + $0x18] sm:$0xff] (%p419_p0)  }
 0x3ed   : > { %2417 = vtanh.f32 %v1343_v60  ;;  %v2442_v60 = vld [vmem:[%s3038_s4 + $0x20] sm:$0xff] (%p419_p0)  }
 0x3f4   : > { %v2412_v61 = vpop.eup %2411 }
 0x3f5   : > { %v2414_v62 = vpop.eup %2413  ;;  %v1336_v63 = vmul.f32 0.5, %v2412_v61  ;;  %v2441_v61 = vld [vmem:[%s3040_s6 + $0x30] sm:$0xff] (%p419_p0)  }
 0x3f6   : > { %v1340_v0 = vmul.f32 0.5, %v2414_v62  ;;  %v2416_v2 = vpop.eup %2415  ;;  %v2444_v62 = vld [vmem:[%s3038_s4 + $0x28] sm:$0xff] (%p419_p0)  }
 0x3f7   : > { %v1337_v1 = vadd.f32 0.5, %v1336_v63  ;;  %v2418_v8 = vpop.eup %2417  ;;  %v2443_v63 = vld [vmem:[%s3040_s6 + $0x38] sm:$0xff] (%p419_p0)  }
 0x3f8   : > { %v1341_v3 = vadd.f32 0.5, %v1340_v0  ;;  %v1345_v23 = vmul.f32 0.5, %v2418_v8  ;;  %v2447_v0 = vld [vmem:[%s3038_s4 + $0x30] sm:$0xff] (%p419_p0)   ;;  %v2206_v8 = vld [vmem:[%s3039_s5] ss:$0 sm:$0xff] (%p419_p0) }
 0x3f9   : > { %v1348_v4 = vmul.f32 %v2416_v2, %v1337_v1  ;;  %v2448_v1 = vld [vmem:[%s3038_s4 + $0x38] sm:$0xff] (%p419_p0)  }
 0x3fa   : > { %v1347_v5 = vmul.f32 %v1341_v3, %v2901_v13  ;;  %v1346_v24 = vadd.f32 0.5, %v1345_v23 }
 0x3fc   : > { %v1349_v7 = vadd.f32 %v1348_v4, %v1347_v5  ;;  %v2193_v5 = vld [vmem:[%s3041_s7] ss:$0 sm:$0xff] (%p419_p0) }
 0x3fe   : > { %2419 = vtanh.f32 %v1349_v7 }
 0x408   : > { %v2420_v25 = vpop.eup %2419 }
 0x409   : > { %v1351_v26 = vmul.f32 %v2420_v25, %v1346_v24 }
 0x40b   : > { %v1352_v27 = vpack.c.bf16 %v1351_v26, %v1351_v26 }
 0x40d   : > { %2153 = vst [vmem:[%s2861_s24 + $0x8] sm:$0xf] %v1352_v27  ;;  %1591 = vmatmul.mubr.bf16.vlgmr.msra.gmra.mrb[12].mxu0 %v1352_v27  ;;  %1632 = vmatmul.mubr.bf16.vlgmr.msra.gmra.mrb[12].mxu1 %v1352_v27 }
 0x40e   :  { %2301 = vmatprep.mubr.msk.bf16.mxu1 (%p419_p0), %vm2478_vm1, %v2477_v49  ;;  %2262 = vmatpush3.bf16.msra.mxu0 (%p419_p0), %v2431_v48 }
 0x40f   :  { %2263 = vmatprep.subr.bf16.mxu0 (%p419_p0), %v2432_v50  ;;  %2286 = vmatpush3.bf16.msra.mxu1 (%p419_p0), %v2434_v51 }
 0x410   :  { %2287 = vmatprep.subr.bf16.mxu1 (%p419_p0), %v2477_v49 }
 0x412   :  { %2264 = vmatpush3.bf16.msra.mxu0 (%p419_p0), %v2432_v50 }
 0x413   :  { %2265 = vmatprep.subr.bf16.mxu0 (%p419_p0), %v2433_v52  ;;  %2288 = vmatpush3.bf16.msra.mxu1 (%p419_p0), %v2436_v53 }
 0x414   :  { %2289 = vmatprep.subr.bf16.mxu1 (%p419_p0), %v2477_v49 }
 0x416   :  { %2266 = vmatpush3.bf16.msra.mxu0 (%p419_p0), %v2433_v52 }
 0x417   :  { %2267 = vmatprep.subr.bf16.mxu0 (%p419_p0), %v2435_v54  ;;  %2290 = vmatpush3.bf16.msra.mxu1 (%p419_p0), %v2438_v55 }
 0x418   :  { %2291 = vmatprep.subr.bf16.mxu1 (%p419_p0), %v2477_v49 }
 0x41a   :  { %2268 = vmatpush3.bf16.msra.mxu0 (%p419_p0), %v2435_v54 }
 0x41b   :  { %2269 = vmatprep.subr.bf16.mxu0 (%p419_p0), %v2437_v56  ;;  %2292 = vmatpush3.bf16.msra.mxu1 (%p419_p0), %v2440_v57 }
 0x41c   :  { %2293 = vmatprep.subr.bf16.mxu1 (%p419_p0), %v2477_v49 }
 0x41e   :  { %2270 = vmatpush3.bf16.msra.mxu0 (%p419_p0), %v2437_v56 }
 0x41f   :  { %2271 = vmatprep.subr.bf16.mxu0 (%p419_p0), %v2439_v59  ;;  %2294 = vmatpush3.bf16.msra.mxu1 (%p419_p0), %v2442_v60 }
 0x420   :  { %2295 = vmatprep.subr.bf16.mxu1 (%p419_p0), %v2477_v49 }
 0x422   :  { %2272 = vmatpush3.bf16.msra.mxu0 (%p419_p0), %v2439_v59 }
 0x423   :  { %2273 = vmatprep.subr.bf16.mxu0 (%p419_p0), %v2441_v61  ;;  %2296 = vmatpush3.bf16.msra.mxu1 (%p419_p0), %v2444_v62 }
 0x424   :  { %2297 = vmatprep.subr.bf16.mxu1 (%p419_p0), %v2477_v49 }
 0x426   :  { %2274 = vmatpush3.bf16.msra.mxu0 (%p419_p0), %v2441_v61 }
 0x427   :  { %2275 = vmatprep.subr.bf16.mxu0 (%p419_p0), %v2443_v63  ;;  %2298 = vmatpush3.bf16.msra.mxu1 (%p419_p0), %v2447_v0 }
 0x428   :  { %2299 = vmatprep.subr.bf16.mxu1 (%p419_p0), %v2477_v49 }
 0x42a   :  { %2276 = vmatpush3.bf16.msra.mxu0 (%p419_p0), %v2443_v63 }
 0x42b   :  { %2300 = vmatpush3.bf16.msra.mxu1 (%p419_p0), %v2448_v1 }
 0x4e0   : > { %v1592_v32 = vpop.f32.mrb[12].mxu0  ;;  %v1633_v33 = vpop.f32.mrb[12].mxu1 }
 0x4e1   : > { %v1640_v34 = vadd.f32 %v1592_v32, %v1362_v29  ;;  %v1594_v42 = vpop.f32.mrb[13].mxu0  ;;  %v1635_v35 = vpop.f32.mrb[13].mxu1  ;;  %v1642_v10 = vadd.f32 %v1633_v33, %v1364_v16 }
 0x4e2   : > { %v1641_v36 = vadd.f32 %v1594_v42, %v1363_v31  ;;  %v1596_v37 = vpop.f32.mrb[14].mxu0  ;;  %v1637_v38 = vpop.f32.mrb[14].mxu1  ;;  %v1643_v12 = vadd.f32 %v1635_v35, %v1365_v11 }
 0x4e3   : > { %v1644_v39 = vmul.f32 0.5, %v1640_v34  ;;  %v1597_v41 = vpop.f32.mrb[15].mxu0  ;;  %v1638_v6 = vpop.f32.mrb[15].mxu1 }
 0x4e4   : > { %v1648_v9 = vmul.f32 0.5, %v1641_v36  ;;  %v1653_v13 = vmul.f32 0.5, %v1643_v12 }
 0x4e5   : > { %2421 = vtanh.f32 %v1644_v39 }
 0x4e6   : > { %2423 = vtanh.f32 %v1648_v9 }
 0x4e7   : > { %2425 = vtanh.f32 %v1642_v10 }
 0x4e8   : > { %2427 = vtanh.f32 %v1653_v13 }
 0x4ef   : > { %v2422_v14 = vpop.eup %2421 }
 0x4f0   : > { %v2424_v40 = vpop.eup %2423  ;;  %v1646_v15 = vmul.f32 0.5, %v2422_v14 }
 0x4f1   : > { %v1650_v20 = vmul.f32 0.5, %v2424_v40  ;;  %v2426_v22 = vpop.eup %2425 }
 0x4f2   : > { %v1647_v21 = vadd.f32 0.5, %v1646_v15  ;;  %v2428_v43 = vpop.eup %2427 }
 0x4f3   : > { %v1651_v17 = vadd.f32 0.5, %v1650_v20  ;;  %v1655_v44 = vmul.f32 0.5, %v2428_v43 }
 0x4f4   : > { %v1658_v18 = vmul.f32 %v2426_v22, %v1647_v21 }
 0x4f5   : > { %v1657_v19 = vmul.f32 %v1651_v17, %v1349_v7  ;;  %v1656_v45 = vadd.f32 0.5, %v1655_v44 }
 0x4f7   : > { %v1659_v40 = vadd.f32 %v1658_v18, %v1657_v19  }
 0x4f9   : > { %2429 = vtanh.f32 %v1659_v40 }
 0x502   :  { %421 = sbr.rel (!%p419_p0) target bundleno = 250 (0xfa), region = 83 }
 0x503   : > { %v2430_v46 = vpop.eup %2429 }
 0x504   : > { %v1661_v41 = vmul.f32 %v2430_v46, %v1656_v45  }
 0x506   : > { %v2943_v47 = vpack.c.bf16 %v1661_v41, %v1661_v41 }
 0x508   : > { %2192 = vst [vmem:[%s2861_s24 + $0xc] sm:$0xf] %v2943_v47  ;;  %2302 = vmatmul.mubr.bf16.vlgmr.msra.gmra.mrb[0].mxu1 (%p419_p0), %v2943_v47 }
 0x50f   :  { %v2445_v58 = vld [vmem:[#allocation5] sm:$0xff]   ;;  %v2446_v2 = vld [vmem:[#allocation5 + $0x8] sm:$0xff]   ;;  %v2449_v3 = vld [vmem:[#allocation5 + $0x10] sm:$0xff]  }
 0x510   :  { %2277 = vmatprep.mubr.bf16.mxu0 %v2445_v58  ;;  %v2450_v4 = vld [vmem:[#allocation5 + $0x18] sm:$0xff]  }
 0x511   :  { %2278 = vmatmul.mubr.bf16.vlgmr.msra.gmra.mrb[0].mxu0 %v2446_v2 }
 0x512   :  { %2281 = vmatprep.mubr.bf16.mxu0 %v2449_v3 }
 0x519   :  { %2282 = vmatmul.mubr.bf16.gmra.mrb[4].mxu0 %v2450_v4 }
 0x5db   :  { %v1954_v27 = vpop.f32.mrb[0].mxu1 }
 0x5dc   :  { %v1955_v30 = vadd.f32 %v2206_v8, %v1954_v27  ;;  %v2303_v31 = vpop.f32.mrb[1].mxu1 }
 0x5dd   :  { %v1957_v33 = vpop.f32.mrb[2].mxu1 }
 0x5de   :  { %1960 = vst [vmem:[%s3042_s8] sm:$0xff] %v1955_v30  ;;  %v2304_v34 = vpop.f32.mrb[3].mxu1 }
 0x5e4   :  { %v2279_v7 = vpop.f32.mrb[0].mxu0 }
 0x5e5   :  { %v1814_v23 = vadd.f32 %v2279_v7, %v2193_v5  ;;  %v1805_v24 = vpop.f32.mrb[1].mxu0 }
 0x5e6   :  { %v1806_v25 = vadd.f32 %v2193_v5, %v1805_v24  ;;  %v2280_v26 = vpop.f32.mrb[2].mxu0 }
 0x5e7   :  { %1838 = vst [vmem:[%s3043_s9 + $0x10] sm:$0xff] %v1814_v23  ;;  %v1817_v28 = vadd.f32 %v2280_v26, %v2193_v5  ;;  %v1808_v29 = vpop.f32.mrb[3].mxu0 }
 0x5e8   :  { %1836 = vst [vmem:[%s3043_s9] sm:$0xff] %v1806_v25  ;;  %v1809_v32 = vadd.f32 %v2193_v5, %v1808_v29 }
 0x5e9   :  { %1839 = vst [vmem:[%s3043_s9 + $0x18] sm:$0xff] %v1817_v28 }
 0x5ea   :  { %1837 = vst [vmem:[%s3043_s9 + $0x8] sm:$0xff] %v1809_v32 }
 0x5ec   :  { %v2283_v16 = vpop.f32.mrb[4].mxu0 }
 0x5ed   :  { %v1830_v42 = vadd.f32 %v2283_v16, %v2193_v5  ;;  %v1821_v35 = vpop.f32.mrb[5].mxu0 }
 0x5ee   :  { %v1822_v36 = vadd.f32 %v2193_v5, %v1821_v35  ;;  %v2284_v37 = vpop.f32.mrb[6].mxu0 }
 0x5ef   :  { %1842 = vst [vmem:[%s3043_s9 + $0x30] sm:$0xff] %v1830_v42  ;;  %v1833_v38 = vadd.f32 %v2284_v37, %v2193_v5  ;;  %v1824_v39 = vpop.f32.mrb[7].mxu0 }
 0x5f0   :  { %1840 = vst [vmem:[%s3043_s9 + $0x20] sm:$0xff] %v1822_v36  ;;  %v1825_v41 = vadd.f32 %v2193_v5, %v1824_v39 }
 0x5f1   :  { %1843 = vst [vmem:[%s3043_s9 + $0x38] sm:$0xff] %v1833_v38 }
 0x5f2   :  { %1841 = vst [vmem:[%s3043_s9 + $0x28] sm:$0xff] %v1825_v41 }

</bundles_post_ra>
